<compile_context>
chip_gen: v5e
topology: v5e:2x2
jax: 0.10.0
libtpu: 0.0.40
codegen_flags: <defaults>
</compile_context>

<pallas_src>
import functools
import math

import jax
import jax.numpy as jnp
from jax.experimental import pallas as pl
from jax.experimental.pallas import tpu as pltpu

# ---------------- model config (small but consistent with the module __init__) ----------
EMBED_DIM = 32
HIDDEN_DIM = 64
NUM_EMBEDDINGS = 50
NUM_MAX_POSITIONS = 16
NUM_HEADS = 4
HEAD_DIM = EMBED_DIM // NUM_HEADS
NUM_LAYERS = 2
CAUSAL = True
LN_EPS = 1e-12
NEG_INF = -1e30  # exp underflows to exactly 0 in f32 -> identical post-softmax to -inf


def _layer_norm(x, gamma, beta):
    # PyTorch nn.LayerNorm: (x - mean) * rsqrt(biased_var + eps) * gamma + beta
    mu = jnp.mean(x, axis=-1, keepdims=True)
    var = jnp.mean((x - mu) ** 2, axis=-1, keepdims=True)
    return (x - mu) * jax.lax.rsqrt(var + LN_EPS) * gamma + beta


# ---------------------------------- Pallas kernel ---------------------------------------
def transformer_kernel(h_ref, wqkv_ref, wo_ref, w1_ref, w2_ref, vecs_ref, o_ref, *, batch):
    """h_ref: [N, E] with N = S*B, seq-major flattening (row = s*B + b)."""
    h = h_ref[...]                                   # [N, E] float32
    N, E = h.shape
    B = batch
    H, Dh, HID = NUM_HEADS, HEAD_DIM, HIDDEN_DIM

    # Combined batch-separation + causal mask over the flattened token axis.
    ri = jax.lax.broadcasted_iota(jnp.int32, (N, N), 0)       # query index i
    ci = jax.lax.broadcasted_iota(jnp.int32, (N, N), 1)       # key index j
    if B & (B - 1) == 0:                                      # power-of-two batch: cheap AND
        same_batch = ((ri ^ ci) & (B - 1)) == 0
    else:
        same_batch = (ri % B) == (ci % B)
    ok = same_batch & (ci <= ri) if CAUSAL else same_batch    # same batch => j<=i <=> s_j<=s_i
    mask = jnp.where(ok, 0.0, NEG_INF).astype(jnp.float32)    # [N, N]

    for l in range(NUM_LAYERS):                               # static loop (num_layers known)
        vec = vecs_ref[l]                                     # [8, 3E] packed vectors
        ln1_g, ln1_b = vec[0:1, :E], vec[1:2, :E]
        ln2_g, ln2_b = vec[2:3, :E], vec[3:4, :E]
        bo, b2 = vec[4:5, :E], vec[5:6, :E]
        b1 = vec[6:7, :HID]
        bqkv = vec[7:8, :]                                    # [1, 3E] (q-scale folded)

        # ---- layer_norm_1 (residual adds to the *normalized* h, as in the module)
        hn = _layer_norm(h, ln1_g, ln1_b)                     # [N, E]

        # ---- nn.MultiheadAttention(h, h, h) with causal attn_mask.
        # One fused lane-dense QKV projection; 1/sqrt(Dh) folded into the q columns.
        qkv = jnp.dot(hn, wqkv_ref[l], preferred_element_type=jnp.float32) + bqkv   # [N, 3E]
        q = qkv[:, :E]
        k = qkv[:, E:2 * E]
        v = qkv[:, 2 * E:]

        heads = []
        for hh in range(H):                                   # static loop over heads
            lo = hh * Dh
            q_h = q[:, lo:lo + Dh]
            k_h = k[:, lo:lo + Dh]
            v_h = v[:, lo:lo + Dh]
            s = pl.dot(q_h, k_h, trans_b=True) + mask         # [N, N]
            m = jnp.max(s, axis=-1, keepdims=True)
            p = jnp.exp(s - m)
            lsum = jnp.sum(p, axis=-1, keepdims=True)
            # exact normalization (review correctness note); applied after the PV dot
            heads.append(jnp.dot(p, v_h, preferred_element_type=jnp.float32) / lsum)
        attn = jnp.concatenate(heads, axis=-1)                # [N, E]
        x = jnp.dot(attn, wo_ref[l], preferred_element_type=jnp.float32) + bo
        # dropout: identity at inference
        h = x + hn

        # ---- layer_norm_2
        hn2 = _layer_norm(h, ln2_g, ln2_b)

        # ---- feed forward: Linear(E,H) -> ReLU -> Linear(H,E)
        ff = jnp.dot(hn2, w1_ref[l], preferred_element_type=jnp.float32) + b1
        ff = jnp.maximum(ff, 0.0)
        ff = jnp.dot(ff, w2_ref[l], preferred_element_type=jnp.float32) + b2
        h = ff + hn2

    # Output stays [N, E] (E=32 < 128 lanes -> one masked vst; negligible at this size).
    o_ref[...] = h


# -------------------------- wrapper-side parameter restructuring -------------------------
def _prep_kernel_params(params):
    """Pre-transpose (contraction-first), fold the q scale, pack into 5 blobs.

    Returns [wqkv, wo, w1, w2, vecs] in the kernel's argument order.
    """
    E, Dh, HID, L = EMBED_DIM, HEAD_DIM, HIDDEN_DIM, NUM_LAYERS
    W3 = 3 * E
    scale = 1.0 / math.sqrt(Dh)
    f32 = lambda a: a.astype(jnp.float32)

    qkv_w = f32(params['qkv_w'])                              # [L, 3E, E] (torch in_proj)
    qkv_b = f32(params['qkv_b'])                              # [L, 3E]

    # contraction-first [L, E, 3E]; fold 1/sqrt(Dh) into the q output columns
    col_scale = jnp.concatenate([jnp.full((E,), scale, jnp.float32),
                                 jnp.ones((2 * E,), jnp.float32)])
    wqkv = jnp.swapaxes(qkv_w, 1, 2) * col_scale[None, None, :]   # [L, E, 3E]
    bqkv = qkv_b * col_scale[None, :]                             # [L, 3E]

    wo = jnp.swapaxes(f32(params['out_w']), 1, 2)             # [L, E, E]
    w1 = jnp.swapaxes(f32(params['ff1_w']), 1, 2)             # [L, E, HID]
    w2 = jnp.swapaxes(f32(params['ff2_w']), 1, 2)             # [L, HID, E]

    def pad_to(v, width):                                     # [L, w] -> [L, width]
        return jnp.pad(v, ((0, 0), (0, width - v.shape[-1])))

    # All biases / LN gammas / betas packed into one [L, 8, 3E] blob (one DMA).
    vecs = jnp.stack([
        pad_to(f32(params['ln1_g']), W3),   # row 0
        pad_to(f32(params['ln1_b']), W3),   # row 1
        pad_to(f32(params['ln2_g']), W3),   # row 2
        pad_to(f32(params['ln2_b']), W3),   # row 3
        pad_to(f32(params['out_b']), W3),   # row 4: bo
        pad_to(f32(params['ff2_b']), W3),   # row 5: b2
        pad_to(f32(params['ff1_b']), W3),   # row 6: b1
        bqkv,                               # row 7
    ], axis=1)                                                # [L, 8, 3E]

    return [wqkv, wo, w1, w2, vecs]


# ------------------------------------ wrapper --------------------------------------------
@jax.jit
def transformer_forward(x_tokens, params):
    """x_tokens: [S, B] int32. Returns [S, B, E] float32 (matches PyTorch forward)."""
    S, B = x_tokens.shape
    E = EMBED_DIM
    # Embedding gathers are glue (plain JAX); gather directly in [S, B, E] layout so the
    # kernel's seq-major [S*B, E] slab reshapes back to [S, B, E] with no transpose at all.
    h = params['tok_emb'][x_tokens]                           # [S, B, E]
    h = (h + params['pos_emb'][:S][:, None, :]).astype(jnp.float32)
    # dropout: identity at inference
    h = h.reshape(S * B, E)                                   # free (leading-dims) reshape

    kparams = _prep_kernel_params(params)
    vmem = pl.BlockSpec(memory_space=pltpu.MemorySpace.VMEM)  # whole array, VMEM resident

    out = pl.pallas_call(
        functools.partial(transformer_kernel, batch=B),
        out_shape=jax.ShapeDtypeStruct((S * B, E), jnp.float32),
        in_specs=[vmem] * (1 + len(kparams)),
        out_specs=vmem,
    )(h, *kparams)
    return out.reshape(S, B, E)                               # free reshape, no transpose


# -------------------------- deterministic parameter init ---------------------------------
def init_params(key):
    E, H, L = EMBED_DIM, HIDDEN_DIM, NUM_LAYERS
    ks = jax.random.split(key, 14)

    def n(k, shape, scale=0.02):
        return (scale * jax.random.normal(k, shape)).astype(jnp.float32)

    return dict(
        tok_emb=n(ks[0], (NUM_EMBEDDINGS, E), 1.0),
        pos_emb=n(ks[1], (NUM_MAX_POSITIONS, E), 1.0),
        ln1_g=(1.0 + n(ks[2], (L, E), 0.1)),
        ln1_b=n(ks[3], (L, E), 0.1),
        qkv_w=n(ks[4], (L, 3 * E, E)),
        qkv_b=n(ks[5], (L, 3 * E)),
        out_w=n(ks[6], (L, E, E)),
        out_b=n(ks[7], (L, E)),
        ln2_g=(1.0 + n(ks[8], (L, E), 0.1)),
        ln2_b=n(ks[9], (L, E), 0.1),
        ff1_w=n(ks[10], (L, H, E)),
        ff1_b=n(ks[11], (L, H)),
        ff2_w=n(ks[12], (L, E, H)),
        ff2_b=n(ks[13], (L, E)),
    )


# ----------------------------- plain-JAX reference (seq-first) ---------------------------
def reference_forward(x_tokens, params):
    S, B = x_tokens.shape
    E = EMBED_DIM
    Dh = HEAD_DIM
    scale = 1.0 / math.sqrt(Dh)
    h = params['tok_emb'][x_tokens] + params['pos_emb'][jnp.arange(S)][:, None, :]  # [S,B,E]
    row = jnp.arange(S)[:, None]
    col = jnp.arange(S)[None, :]
    mask = jnp.where(col > row, NEG_INF, 0.0) if CAUSAL else jnp.zeros((S, S))

    def ln(x, g, b):
        mu = x.mean(-1, keepdims=True)
        var = ((x - mu) ** 2).mean(-1, keepdims=True)
        return (x - mu) / jnp.sqrt(var + LN_EPS) * g + b

    for l in range(NUM_LAYERS):
        hn = ln(h, params['ln1_g'][l], params['ln1_b'][l])
        qkv = hn @ params['qkv_w'][l].T + params['qkv_b'][l]
        q, k, v = qkv[..., :E] * scale, qkv[..., E:2 * E], qkv[..., 2 * E:]

        def split(t):
            return t.reshape(S, B, NUM_HEADS, Dh).transpose(1, 2, 0, 3)   # [B,H,S,Dh]

        qh, kh, vh = split(q), split(k), split(v)
        s = jnp.einsum('bhqd,bhkd->bhqk', qh, kh) + mask
        p = jax.nn.softmax(s, axis=-1)
        o = jnp.einsum('bhqk,bhkd->bhqd', p, vh)
        o = o.transpose(2, 0, 1, 3).reshape(S, B, E)
        x = o @ params['out_w'][l].T + params['out_b'][l]
        h = x + hn                                  # residual adds to normalized h (module semantics)
        hn2 = ln(h, params['ln2_g'][l], params['ln2_b'][l])
        ff = jax.nn.relu(hn2 @ params['ff1_w'][l].T + params['ff1_b'][l])
        ff = ff @ params['ff2_w'][l].T + params['ff2_b'][l]
        h = ff + hn2
    return h


if __name__ == "__main__":
    key = jax.random.PRNGKey(0)
    k_tok, k_params = jax.random.split(key)
    S, B = 8, 2
    x = jax.random.randint(k_tok, (S, B), 0, NUM_EMBEDDINGS, dtype=jnp.int32)
    params = init_params(k_params)

    out = jax.block_until_ready(transformer_forward(x, params))
    ref = reference_forward(x, params)

    assert out.shape == (S, B, EMBED_DIM), out.shape
    err = float(jnp.max(jnp.abs(out - ref)))
    # tolerance accounts for EUP rsqrt in LayerNorm (softmax divide is now exact)
    assert err < 2e-3, f"mismatch vs reference: {err}"
    print("KERNEL_OK")
</pallas_src>

<mosaic_0001>
module attributes {stable_mosaic.version = 11 : i64} {
  func.func @transformer_kernel(%arg0: memref<16x32xf32, #tpu.memory_space<vmem>>, %arg1: memref<2x32x96xf32, #tpu.memory_space<vmem>>, %arg2: memref<2x32x32xf32, #tpu.memory_space<vmem>>, %arg3: memref<2x32x64xf32, #tpu.memory_space<vmem>>, %arg4: memref<2x64x32xf32, #tpu.memory_space<vmem>>, %arg5: memref<2x8x96xf32, #tpu.memory_space<vmem>>, %arg6: memref<16x32xf32, #tpu.memory_space<vmem>>) attributes {dimension_semantics = [], scalar_prefetch = 0 : i64, scratch_operands = 0 : i64, tpu.core_type = #tpu.core_type<tc>} {
    %c0 = arith.constant 0 : index
    %c0_0 = arith.constant 0 : index
    %0 = vector.load %arg0[%c0, %c0_0] : memref<16x32xf32, #tpu.memory_space<vmem>>, vector<16x32xf32>
    %1 = tpu.iota {dimensions = array<i32: 0>} : vector<16x16xi32>
    %2 = tpu.iota {dimensions = array<i32: 1>} : vector<16x16xi32>
    %3 = arith.xori %1, %2 : vector<16x16xi32>
    %c1_i32 = arith.constant 1 : i32
    %4 = vector.broadcast %c1_i32 : i32 to vector<16x16xi32>
    %5 = arith.andi %3, %4 : vector<16x16xi32>
    %c0_i32 = arith.constant 0 : i32
    %6 = vector.broadcast %c0_i32 : i32 to vector<16x16xi32>
    %7 = arith.cmpi eq, %5, %6 : vector<16x16xi32>
    %8 = arith.cmpi sle, %2, %1 : vector<16x16xi32>
    %9 = arith.andi %7, %8 : vector<16x16xi1>
    %cst = arith.constant 0.000000e+00 : f32
    %cst_1 = arith.constant -1.000000e+30 : f32
    %10 = vector.broadcast %cst : f32 to vector<16x16xf32>
    %11 = vector.broadcast %cst_1 : f32 to vector<16x16xf32>
    %12 = arith.select %9, %10, %11 : vector<16x16xi1>, vector<16x16xf32>
    %c0_2 = arith.constant 0 : index
    %c0_3 = arith.constant 0 : index
    %c0_4 = arith.constant 0 : index
    %13 = vector.load %arg5[%c0_2, %c0_3, %c0_4] : memref<2x8x96xf32, #tpu.memory_space<vmem>>, vector<1x8x96xf32>
    %14 = vector.shape_cast %13 : vector<1x8x96xf32> to vector<8x96xf32>
    %15 = vector.extract_strided_slice %14 {offsets = [0, 0], sizes = [1, 32], strides = [1, 1]} : vector<8x96xf32> to vector<1x32xf32>
    %16 = vector.extract_strided_slice %14 {offsets = [1, 0], sizes = [1, 32], strides = [1, 1]} : vector<8x96xf32> to vector<1x32xf32>
    %17 = vector.extract_strided_slice %14 {offsets = [2, 0], sizes = [1, 32], strides = [1, 1]} : vector<8x96xf32> to vector<1x32xf32>
    %18 = vector.extract_strided_slice %14 {offsets = [3, 0], sizes = [1, 32], strides = [1, 1]} : vector<8x96xf32> to vector<1x32xf32>
    %19 = vector.extract_strided_slice %14 {offsets = [4, 0], sizes = [1, 32], strides = [1, 1]} : vector<8x96xf32> to vector<1x32xf32>
    %20 = vector.extract_strided_slice %14 {offsets = [5, 0], sizes = [1, 32], strides = [1, 1]} : vector<8x96xf32> to vector<1x32xf32>
    %21 = vector.extract_strided_slice %14 {offsets = [6, 0], sizes = [1, 64], strides = [1, 1]} : vector<8x96xf32> to vector<1x64xf32>
    %22 = vector.extract_strided_slice %14 {offsets = [7, 0], sizes = [1, 96], strides = [1, 1]} : vector<8x96xf32> to vector<1x96xf32>
    %cst_5 = arith.constant dense<0.000000e+00> : vector<16xf32>
    %23 = vector.multi_reduction <add>, %0, %cst_5 [1] : vector<16x32xf32> to vector<16xf32>
    %24 = vector.shape_cast %23 : vector<16xf32> to vector<16x1xf32>
    %cst_6 = arith.constant 3.200000e+01 : f32
    %25 = vector.broadcast %cst_6 : f32 to vector<16x1xf32>
    %26 = arith.divf %24, %25 : vector<16x1xf32>
    %27 = vector.broadcast %26 : vector<16x1xf32> to vector<16x32xf32>
    %28 = arith.subf %0, %27 : vector<16x32xf32>
    %29 = arith.mulf %28, %28 : vector<16x32xf32>
    %cst_7 = arith.constant dense<0.000000e+00> : vector<16xf32>
    %30 = vector.multi_reduction <add>, %29, %cst_7 [1] : vector<16x32xf32> to vector<16xf32>
    %31 = vector.shape_cast %30 : vector<16xf32> to vector<16x1xf32>
    %cst_8 = arith.constant 3.200000e+01 : f32
    %32 = vector.broadcast %cst_8 : f32 to vector<16x1xf32>
    %33 = arith.divf %31, %32 : vector<16x1xf32>
    %34 = vector.broadcast %26 : vector<16x1xf32> to vector<16x32xf32>
    %35 = arith.subf %0, %34 : vector<16x32xf32>
    %cst_9 = arith.constant 9.99999996E-13 : f32
    %36 = vector.broadcast %cst_9 : f32 to vector<16x1xf32>
    %37 = arith.addf %33, %36 : vector<16x1xf32>
    %38 = math.rsqrt %37 : vector<16x1xf32>
    %39 = vector.broadcast %38 : vector<16x1xf32> to vector<16x32xf32>
    %40 = arith.mulf %35, %39 : vector<16x32xf32>
    %41 = vector.broadcast %15 : vector<1x32xf32> to vector<16x32xf32>
    %42 = arith.mulf %40, %41 : vector<16x32xf32>
    %43 = vector.broadcast %16 : vector<1x32xf32> to vector<16x32xf32>
    %44 = arith.addf %42, %43 : vector<16x32xf32>
    %c0_10 = arith.constant 0 : index
    %c0_11 = arith.constant 0 : index
    %c0_12 = arith.constant 0 : index
    %45 = vector.load %arg1[%c0_10, %c0_11, %c0_12] : memref<2x32x96xf32, #tpu.memory_space<vmem>>, vector<1x32x96xf32>
    %46 = vector.shape_cast %45 : vector<1x32x96xf32> to vector<32x96xf32>
    %cst_13 = arith.constant dense<0.000000e+00> : vector<16x96xf32>
    %47 = tpu.matmul %44, %46, %cst_13 {dimension_numbers = #tpu.dot_dimension_numbers<[1], [0], [0], [1], [0, 0, 1, 1], [], []>} : vector<16x32xf32>, vector<32x96xf32>, vector<16x96xf32> -> vector<16x96xf32>
    %48 = vector.broadcast %22 : vector<1x96xf32> to vector<16x96xf32>
    %49 = arith.addf %47, %48 : vector<16x96xf32>
    %50 = vector.extract_strided_slice %49 {offsets = [0, 0], sizes = [16, 32], strides = [1, 1]} : vector<16x96xf32> to vector<16x32xf32>
    %51 = vector.extract_strided_slice %49 {offsets = [0, 32], sizes = [16, 32], strides = [1, 1]} : vector<16x96xf32> to vector<16x32xf32>
    %52 = vector.extract_strided_slice %49 {offsets = [0, 64], sizes = [16, 32], strides = [1, 1]} : vector<16x96xf32> to vector<16x32xf32>
    %53 = vector.extract_strided_slice %50 {offsets = [0, 0], sizes = [16, 8], strides = [1, 1]} : vector<16x32xf32> to vector<16x8xf32>
    %54 = vector.extract_strided_slice %51 {offsets = [0, 0], sizes = [16, 8], strides = [1, 1]} : vector<16x32xf32> to vector<16x8xf32>
    %55 = vector.extract_strided_slice %52 {offsets = [0, 0], sizes = [16, 8], strides = [1, 1]} : vector<16x32xf32> to vector<16x8xf32>
    %cst_14 = arith.constant dense<0.000000e+00> : vector<16x16xf32>
    %56 = tpu.matmul %53, %54, %cst_14 {dimension_numbers = #tpu.dot_dimension_numbers<[1], [1], [0], [0], [0, 0, 1, 0], [], []>} : vector<16x8xf32>, vector<16x8xf32>, vector<16x16xf32> -> vector<16x16xf32>
    %57 = arith.addf %56, %12 : vector<16x16xf32>
    %cst_15 = arith.constant dense<0xFF800000> : vector<16xf32>
    %58 = vector.multi_reduction <maximumf>, %57, %cst_15 [1] : vector<16x16xf32> to vector<16xf32>
    %59 = vector.shape_cast %58 : vector<16xf32> to vector<16x1xf32>
    %60 = vector.broadcast %59 : vector<16x1xf32> to vector<16x16xf32>
    %61 = arith.subf %57, %60 : vector<16x16xf32>
    %62 = math.exp %61 : vector<16x16xf32>
    %cst_16 = arith.constant dense<0.000000e+00> : vector<16xf32>
    %63 = vector.multi_reduction <add>, %62, %cst_16 [1] : vector<16x16xf32> to vector<16xf32>
    %64 = vector.shape_cast %63 : vector<16xf32> to vector<16x1xf32>
    %cst_17 = arith.constant dense<0.000000e+00> : vector<16x8xf32>
    %65 = tpu.matmul %62, %55, %cst_17 {dimension_numbers = #tpu.dot_dimension_numbers<[1], [0], [0], [1], [0, 0, 1, 1], [], []>} : vector<16x16xf32>, vector<16x8xf32>, vector<16x8xf32> -> vector<16x8xf32>
    %66 = vector.broadcast %64 : vector<16x1xf32> to vector<16x8xf32>
    %67 = arith.divf %65, %66 : vector<16x8xf32>
    %68 = vector.extract_strided_slice %50 {offsets = [0, 8], sizes = [16, 8], strides = [1, 1]} : vector<16x32xf32> to vector<16x8xf32>
    %69 = vector.extract_strided_slice %51 {offsets = [0, 8], sizes = [16, 8], strides = [1, 1]} : vector<16x32xf32> to vector<16x8xf32>
    %70 = vector.extract_strided_slice %52 {offsets = [0, 8], sizes = [16, 8], strides = [1, 1]} : vector<16x32xf32> to vector<16x8xf32>
    %cst_18 = arith.constant dense<0.000000e+00> : vector<16x16xf32>
    %71 = tpu.matmul %68, %69, %cst_18 {dimension_numbers = #tpu.dot_dimension_numbers<[1], [1], [0], [0], [0, 0, 1, 0], [], []>} : vector<16x8xf32>, vector<16x8xf32>, vector<16x16xf32> -> vector<16x16xf32>
    %72 = arith.addf %71, %12 : vector<16x16xf32>
    %cst_19 = arith.constant dense<0xFF800000> : vector<16xf32>
    %73 = vector.multi_reduction <maximumf>, %72, %cst_19 [1] : vector<16x16xf32> to vector<16xf32>
    %74 = vector.shape_cast %73 : vector<16xf32> to vector<16x1xf32>
    %75 = vector.broadcast %74 : vector<16x1xf32> to vector<16x16xf32>
    %76 = arith.subf %72, %75 : vector<16x16xf32>
    %77 = math.exp %76 : vector<16x16xf32>
    %cst_20 = arith.constant dense<0.000000e+00> : vector<16xf32>
    %78 = vector.multi_reduction <add>, %77, %cst_20 [1] : vector<16x16xf32> to vector<16xf32>
    %79 = vector.shape_cast %78 : vector<16xf32> to vector<16x1xf32>
    %cst_21 = arith.constant dense<0.000000e+00> : vector<16x8xf32>
    %80 = tpu.matmul %77, %70, %cst_21 {dimension_numbers = #tpu.dot_dimension_numbers<[1], [0], [0], [1], [0, 0, 1, 1], [], []>} : vector<16x16xf32>, vector<16x8xf32>, vector<16x8xf32> -> vector<16x8xf32>
    %81 = vector.broadcast %79 : vector<16x1xf32> to vector<16x8xf32>
    %82 = arith.divf %80, %81 : vector<16x8xf32>
    %83 = vector.extract_strided_slice %50 {offsets = [0, 16], sizes = [16, 8], strides = [1, 1]} : vector<16x32xf32> to vector<16x8xf32>
    %84 = vector.extract_strided_slice %51 {offsets = [0, 16], sizes = [16, 8], strides = [1, 1]} : vector<16x32xf32> to vector<16x8xf32>
    %85 = vector.extract_strided_slice %52 {offsets = [0, 16], sizes = [16, 8], strides = [1, 1]} : vector<16x32xf32> to vector<16x8xf32>
    %cst_22 = arith.constant dense<0.000000e+00> : vector<16x16xf32>
    %86 = tpu.matmul %83, %84, %cst_22 {dimension_numbers = #tpu.dot_dimension_numbers<[1], [1], [0], [0], [0, 0, 1, 0], [], []>} : vector<16x8xf32>, vector<16x8xf32>, vector<16x16xf32> -> vector<16x16xf32>
    %87 = arith.addf %86, %12 : vector<16x16xf32>
    %cst_23 = arith.constant dense<0xFF800000> : vector<16xf32>
    %88 = vector.multi_reduction <maximumf>, %87, %cst_23 [1] : vector<16x16xf32> to vector<16xf32>
    %89 = vector.shape_cast %88 : vector<16xf32> to vector<16x1xf32>
    %90 = vector.broadcast %89 : vector<16x1xf32> to vector<16x16xf32>
    %91 = arith.subf %87, %90 : vector<16x16xf32>
    %92 = math.exp %91 : vector<16x16xf32>
    %cst_24 = arith.constant dense<0.000000e+00> : vector<16xf32>
    %93 = vector.multi_reduction <add>, %92, %cst_24 [1] : vector<16x16xf32> to vector<16xf32>
    %94 = vector.shape_cast %93 : vector<16xf32> to vector<16x1xf32>
    %cst_25 = arith.constant dense<0.000000e+00> : vector<16x8xf32>
    %95 = tpu.matmul %92, %85, %cst_25 {dimension_numbers = #tpu.dot_dimension_numbers<[1], [0], [0], [1], [0, 0, 1, 1], [], []>} : vector<16x16xf32>, vector<16x8xf32>, vector<16x8xf32> -> vector<16x8xf32>
    %96 = vector.broadcast %94 : vector<16x1xf32> to vector<16x8xf32>
    %97 = arith.divf %95, %96 : vector<16x8xf32>
    %98 = vector.extract_strided_slice %50 {offsets = [0, 24], sizes = [16, 8], strides = [1, 1]} : vector<16x32xf32> to vector<16x8xf32>
    %99 = vector.extract_strided_slice %51 {offsets = [0, 24], sizes = [16, 8], strides = [1, 1]} : vector<16x32xf32> to vector<16x8xf32>
    %100 = vector.extract_strided_slice %52 {offsets = [0, 24], sizes = [16, 8], strides = [1, 1]} : vector<16x32xf32> to vector<16x8xf32>
    %cst_26 = arith.constant dense<0.000000e+00> : vector<16x16xf32>
    %101 = tpu.matmul %98, %99, %cst_26 {dimension_numbers = #tpu.dot_dimension_numbers<[1], [1], [0], [0], [0, 0, 1, 0], [], []>} : vector<16x8xf32>, vector<16x8xf32>, vector<16x16xf32> -> vector<16x16xf32>
    %102 = arith.addf %101, %12 : vector<16x16xf32>
    %cst_27 = arith.constant dense<0xFF800000> : vector<16xf32>
    %103 = vector.multi_reduction <maximumf>, %102, %cst_27 [1] : vector<16x16xf32> to vector<16xf32>
    %104 = vector.shape_cast %103 : vector<16xf32> to vector<16x1xf32>
    %105 = vector.broadcast %104 : vector<16x1xf32> to vector<16x16xf32>
    %106 = arith.subf %102, %105 : vector<16x16xf32>
    %107 = math.exp %106 : vector<16x16xf32>
    %cst_28 = arith.constant dense<0.000000e+00> : vector<16xf32>
    %108 = vector.multi_reduction <add>, %107, %cst_28 [1] : vector<16x16xf32> to vector<16xf32>
    %109 = vector.shape_cast %108 : vector<16xf32> to vector<16x1xf32>
    %cst_29 = arith.constant dense<0.000000e+00> : vector<16x8xf32>
    %110 = tpu.matmul %107, %100, %cst_29 {dimension_numbers = #tpu.dot_dimension_numbers<[1], [0], [0], [1], [0, 0, 1, 1], [], []>} : vector<16x16xf32>, vector<16x8xf32>, vector<16x8xf32> -> vector<16x8xf32>
    %111 = vector.broadcast %109 : vector<16x1xf32> to vector<16x8xf32>
    %112 = arith.divf %110, %111 : vector<16x8xf32>
    %113 = tpu.concatenate %67, %82, %97, %112 in 1 : vector<16x8xf32>, vector<16x8xf32>, vector<16x8xf32>, vector<16x8xf32> -> vector<16x32xf32>
    %c0_30 = arith.constant 0 : index
    %c0_31 = arith.constant 0 : index
    %c0_32 = arith.constant 0 : index
    %114 = vector.load %arg2[%c0_30, %c0_31, %c0_32] : memref<2x32x32xf32, #tpu.memory_space<vmem>>, vector<1x32x32xf32>
    %115 = vector.shape_cast %114 : vector<1x32x32xf32> to vector<32x32xf32>
    %cst_33 = arith.constant dense<0.000000e+00> : vector<16x32xf32>
    %116 = tpu.matmul %113, %115, %cst_33 {dimension_numbers = #tpu.dot_dimension_numbers<[1], [0], [0], [1], [0, 0, 1, 1], [], []>} : vector<16x32xf32>, vector<32x32xf32>, vector<16x32xf32> -> vector<16x32xf32>
    %117 = vector.broadcast %19 : vector<1x32xf32> to vector<16x32xf32>
    %118 = arith.addf %116, %117 : vector<16x32xf32>
    %119 = arith.addf %118, %44 : vector<16x32xf32>
    %cst_34 = arith.constant dense<0.000000e+00> : vector<16xf32>
    %120 = vector.multi_reduction <add>, %119, %cst_34 [1] : vector<16x32xf32> to vector<16xf32>
    %121 = vector.shape_cast %120 : vector<16xf32> to vector<16x1xf32>
    %cst_35 = arith.constant 3.200000e+01 : f32
    %122 = vector.broadcast %cst_35 : f32 to vector<16x1xf32>
    %123 = arith.divf %121, %122 : vector<16x1xf32>
    %124 = vector.broadcast %123 : vector<16x1xf32> to vector<16x32xf32>
    %125 = arith.subf %119, %124 : vector<16x32xf32>
    %126 = arith.mulf %125, %125 : vector<16x32xf32>
    %cst_36 = arith.constant dense<0.000000e+00> : vector<16xf32>
    %127 = vector.multi_reduction <add>, %126, %cst_36 [1] : vector<16x32xf32> to vector<16xf32>
    %128 = vector.shape_cast %127 : vector<16xf32> to vector<16x1xf32>
    %cst_37 = arith.constant 3.200000e+01 : f32
    %129 = vector.broadcast %cst_37 : f32 to vector<16x1xf32>
    %130 = arith.divf %128, %129 : vector<16x1xf32>
    %131 = vector.broadcast %123 : vector<16x1xf32> to vector<16x32xf32>
    %132 = arith.subf %119, %131 : vector<16x32xf32>
    %cst_38 = arith.constant 9.99999996E-13 : f32
    %133 = vector.broadcast %cst_38 : f32 to vector<16x1xf32>
    %134 = arith.addf %130, %133 : vector<16x1xf32>
    %135 = math.rsqrt %134 : vector<16x1xf32>
    %136 = vector.broadcast %135 : vector<16x1xf32> to vector<16x32xf32>
    %137 = arith.mulf %132, %136 : vector<16x32xf32>
    %138 = vector.broadcast %17 : vector<1x32xf32> to vector<16x32xf32>
    %139 = arith.mulf %137, %138 : vector<16x32xf32>
    %140 = vector.broadcast %18 : vector<1x32xf32> to vector<16x32xf32>
    %141 = arith.addf %139, %140 : vector<16x32xf32>
    %c0_39 = arith.constant 0 : index
    %c0_40 = arith.constant 0 : index
    %c0_41 = arith.constant 0 : index
    %142 = vector.load %arg3[%c0_39, %c0_40, %c0_41] : memref<2x32x64xf32, #tpu.memory_space<vmem>>, vector<1x32x64xf32>
    %143 = vector.shape_cast %142 : vector<1x32x64xf32> to vector<32x64xf32>
    %cst_42 = arith.constant dense<0.000000e+00> : vector<16x64xf32>
    %144 = tpu.matmul %141, %143, %cst_42 {dimension_numbers = #tpu.dot_dimension_numbers<[1], [0], [0], [1], [0, 0, 1, 1], [], []>} : vector<16x32xf32>, vector<32x64xf32>, vector<16x64xf32> -> vector<16x64xf32>
    %145 = vector.broadcast %21 : vector<1x64xf32> to vector<16x64xf32>
    %146 = arith.addf %144, %145 : vector<16x64xf32>
    %cst_43 = arith.constant 0.000000e+00 : f32
    %147 = vector.broadcast %cst_43 : f32 to vector<16x64xf32>
    %148 = arith.maximumf %146, %147 : vector<16x64xf32>
    %c0_44 = arith.constant 0 : index
    %c0_45 = arith.constant 0 : index
    %c0_46 = arith.constant 0 : index
    %149 = vector.load %arg4[%c0_44, %c0_45, %c0_46] : memref<2x64x32xf32, #tpu.memory_space<vmem>>, vector<1x64x32xf32>
    %150 = vector.shape_cast %149 : vector<1x64x32xf32> to vector<64x32xf32>
    %cst_47 = arith.constant dense<0.000000e+00> : vector<16x32xf32>
    %151 = tpu.matmul %148, %150, %cst_47 {dimension_numbers = #tpu.dot_dimension_numbers<[1], [0], [0], [1], [0, 0, 1, 1], [], []>} : vector<16x64xf32>, vector<64x32xf32>, vector<16x32xf32> -> vector<16x32xf32>
    %152 = vector.broadcast %20 : vector<1x32xf32> to vector<16x32xf32>
    %153 = arith.addf %151, %152 : vector<16x32xf32>
    %154 = arith.addf %153, %141 : vector<16x32xf32>
    %c1 = arith.constant 1 : index
    %c0_48 = arith.constant 0 : index
    %c0_49 = arith.constant 0 : index
    %155 = vector.load %arg5[%c1, %c0_48, %c0_49] : memref<2x8x96xf32, #tpu.memory_space<vmem>>, vector<1x8x96xf32>
    %156 = vector.shape_cast %155 : vector<1x8x96xf32> to vector<8x96xf32>
    %157 = vector.extract_strided_slice %156 {offsets = [0, 0], sizes = [1, 32], strides = [1, 1]} : vector<8x96xf32> to vector<1x32xf32>
    %158 = vector.extract_strided_slice %156 {offsets = [1, 0], sizes = [1, 32], strides = [1, 1]} : vector<8x96xf32> to vector<1x32xf32>
    %159 = vector.extract_strided_slice %156 {offsets = [2, 0], sizes = [1, 32], strides = [1, 1]} : vector<8x96xf32> to vector<1x32xf32>
    %160 = vector.extract_strided_slice %156 {offsets = [3, 0], sizes = [1, 32], strides = [1, 1]} : vector<8x96xf32> to vector<1x32xf32>
    %161 = vector.extract_strided_slice %156 {offsets = [4, 0], sizes = [1, 32], strides = [1, 1]} : vector<8x96xf32> to vector<1x32xf32>
    %162 = vector.extract_strided_slice %156 {offsets = [5, 0], sizes = [1, 32], strides = [1, 1]} : vector<8x96xf32> to vector<1x32xf32>
    %163 = vector.extract_strided_slice %156 {offsets = [6, 0], sizes = [1, 64], strides = [1, 1]} : vector<8x96xf32> to vector<1x64xf32>
    %164 = vector.extract_strided_slice %156 {offsets = [7, 0], sizes = [1, 96], strides = [1, 1]} : vector<8x96xf32> to vector<1x96xf32>
    %cst_50 = arith.constant dense<0.000000e+00> : vector<16xf32>
    %165 = vector.multi_reduction <add>, %154, %cst_50 [1] : vector<16x32xf32> to vector<16xf32>
    %166 = vector.shape_cast %165 : vector<16xf32> to vector<16x1xf32>
    %cst_51 = arith.constant 3.200000e+01 : f32
    %167 = vector.broadcast %cst_51 : f32 to vector<16x1xf32>
    %168 = arith.divf %166, %167 : vector<16x1xf32>
    %169 = vector.broadcast %168 : vector<16x1xf32> to vector<16x32xf32>
    %170 = arith.subf %154, %169 : vector<16x32xf32>
    %171 = arith.mulf %170, %170 : vector<16x32xf32>
    %cst_52 = arith.constant dense<0.000000e+00> : vector<16xf32>
    %172 = vector.multi_reduction <add>, %171, %cst_52 [1] : vector<16x32xf32> to vector<16xf32>
    %173 = vector.shape_cast %172 : vector<16xf32> to vector<16x1xf32>
    %cst_53 = arith.constant 3.200000e+01 : f32
    %174 = vector.broadcast %cst_53 : f32 to vector<16x1xf32>
    %175 = arith.divf %173, %174 : vector<16x1xf32>
    %176 = vector.broadcast %168 : vector<16x1xf32> to vector<16x32xf32>
    %177 = arith.subf %154, %176 : vector<16x32xf32>
    %cst_54 = arith.constant 9.99999996E-13 : f32
    %178 = vector.broadcast %cst_54 : f32 to vector<16x1xf32>
    %179 = arith.addf %175, %178 : vector<16x1xf32>
    %180 = math.rsqrt %179 : vector<16x1xf32>
    %181 = vector.broadcast %180 : vector<16x1xf32> to vector<16x32xf32>
    %182 = arith.mulf %177, %181 : vector<16x32xf32>
    %183 = vector.broadcast %157 : vector<1x32xf32> to vector<16x32xf32>
    %184 = arith.mulf %182, %183 : vector<16x32xf32>
    %185 = vector.broadcast %158 : vector<1x32xf32> to vector<16x32xf32>
    %186 = arith.addf %184, %185 : vector<16x32xf32>
    %c1_55 = arith.constant 1 : index
    %c0_56 = arith.constant 0 : index
    %c0_57 = arith.constant 0 : index
    %187 = vector.load %arg1[%c1_55, %c0_56, %c0_57] : memref<2x32x96xf32, #tpu.memory_space<vmem>>, vector<1x32x96xf32>
    %188 = vector.shape_cast %187 : vector<1x32x96xf32> to vector<32x96xf32>
    %cst_58 = arith.constant dense<0.000000e+00> : vector<16x96xf32>
    %189 = tpu.matmul %186, %188, %cst_58 {dimension_numbers = #tpu.dot_dimension_numbers<[1], [0], [0], [1], [0, 0, 1, 1], [], []>} : vector<16x32xf32>, vector<32x96xf32>, vector<16x96xf32> -> vector<16x96xf32>
    %190 = vector.broadcast %164 : vector<1x96xf32> to vector<16x96xf32>
    %191 = arith.addf %189, %190 : vector<16x96xf32>
    %192 = vector.extract_strided_slice %191 {offsets = [0, 0], sizes = [16, 32], strides = [1, 1]} : vector<16x96xf32> to vector<16x32xf32>
    %193 = vector.extract_strided_slice %191 {offsets = [0, 32], sizes = [16, 32], strides = [1, 1]} : vector<16x96xf32> to vector<16x32xf32>
    %194 = vector.extract_strided_slice %191 {offsets = [0, 64], sizes = [16, 32], strides = [1, 1]} : vector<16x96xf32> to vector<16x32xf32>
    %195 = vector.extract_strided_slice %192 {offsets = [0, 0], sizes = [16, 8], strides = [1, 1]} : vector<16x32xf32> to vector<16x8xf32>
    %196 = vector.extract_strided_slice %193 {offsets = [0, 0], sizes = [16, 8], strides = [1, 1]} : vector<16x32xf32> to vector<16x8xf32>
    %197 = vector.extract_strided_slice %194 {offsets = [0, 0], sizes = [16, 8], strides = [1, 1]} : vector<16x32xf32> to vector<16x8xf32>
    %cst_59 = arith.constant dense<0.000000e+00> : vector<16x16xf32>
    %198 = tpu.matmul %195, %196, %cst_59 {dimension_numbers = #tpu.dot_dimension_numbers<[1], [1], [0], [0], [0, 0, 1, 0], [], []>} : vector<16x8xf32>, vector<16x8xf32>, vector<16x16xf32> -> vector<16x16xf32>
    %199 = arith.addf %198, %12 : vector<16x16xf32>
    %cst_60 = arith.constant dense<0xFF800000> : vector<16xf32>
    %200 = vector.multi_reduction <maximumf>, %199, %cst_60 [1] : vector<16x16xf32> to vector<16xf32>
    %201 = vector.shape_cast %200 : vector<16xf32> to vector<16x1xf32>
    %202 = vector.broadcast %201 : vector<16x1xf32> to vector<16x16xf32>
    %203 = arith.subf %199, %202 : vector<16x16xf32>
    %204 = math.exp %203 : vector<16x16xf32>
    %cst_61 = arith.constant dense<0.000000e+00> : vector<16xf32>
    %205 = vector.multi_reduction <add>, %204, %cst_61 [1] : vector<16x16xf32> to vector<16xf32>
    %206 = vector.shape_cast %205 : vector<16xf32> to vector<16x1xf32>
    %cst_62 = arith.constant dense<0.000000e+00> : vector<16x8xf32>
    %207 = tpu.matmul %204, %197, %cst_62 {dimension_numbers = #tpu.dot_dimension_numbers<[1], [0], [0], [1], [0, 0, 1, 1], [], []>} : vector<16x16xf32>, vector<16x8xf32>, vector<16x8xf32> -> vector<16x8xf32>
    %208 = vector.broadcast %206 : vector<16x1xf32> to vector<16x8xf32>
    %209 = arith.divf %207, %208 : vector<16x8xf32>
    %210 = vector.extract_strided_slice %192 {offsets = [0, 8], sizes = [16, 8], strides = [1, 1]} : vector<16x32xf32> to vector<16x8xf32>
    %211 = vector.extract_strided_slice %193 {offsets = [0, 8], sizes = [16, 8], strides = [1, 1]} : vector<16x32xf32> to vector<16x8xf32>
    %212 = vector.extract_strided_slice %194 {offsets = [0, 8], sizes = [16, 8], strides = [1, 1]} : vector<16x32xf32> to vector<16x8xf32>
    %cst_63 = arith.constant dense<0.000000e+00> : vector<16x16xf32>
    %213 = tpu.matmul %210, %211, %cst_63 {dimension_numbers = #tpu.dot_dimension_numbers<[1], [1], [0], [0], [0, 0, 1, 0], [], []>} : vector<16x8xf32>, vector<16x8xf32>, vector<16x16xf32> -> vector<16x16xf32>
    %214 = arith.addf %213, %12 : vector<16x16xf32>
    %cst_64 = arith.constant dense<0xFF800000> : vector<16xf32>
    %215 = vector.multi_reduction <maximumf>, %214, %cst_64 [1] : vector<16x16xf32> to vector<16xf32>
    %216 = vector.shape_cast %215 : vector<16xf32> to vector<16x1xf32>
    %217 = vector.broadcast %216 : vector<16x1xf32> to vector<16x16xf32>
    %218 = arith.subf %214, %217 : vector<16x16xf32>
    %219 = math.exp %218 : vector<16x16xf32>
    %cst_65 = arith.constant dense<0.000000e+00> : vector<16xf32>
    %220 = vector.multi_reduction <add>, %219, %cst_65 [1] : vector<16x16xf32> to vector<16xf32>
    %221 = vector.shape_cast %220 : vector<16xf32> to vector<16x1xf32>
    %cst_66 = arith.constant dense<0.000000e+00> : vector<16x8xf32>
    %222 = tpu.matmul %219, %212, %cst_66 {dimension_numbers = #tpu.dot_dimension_numbers<[1], [0], [0], [1], [0, 0, 1, 1], [], []>} : vector<16x16xf32>, vector<16x8xf32>, vector<16x8xf32> -> vector<16x8xf32>
    %223 = vector.broadcast %221 : vector<16x1xf32> to vector<16x8xf32>
    %224 = arith.divf %222, %223 : vector<16x8xf32>
    %225 = vector.extract_strided_slice %192 {offsets = [0, 16], sizes = [16, 8], strides = [1, 1]} : vector<16x32xf32> to vector<16x8xf32>
    %226 = vector.extract_strided_slice %193 {offsets = [0, 16], sizes = [16, 8], strides = [1, 1]} : vector<16x32xf32> to vector<16x8xf32>
    %227 = vector.extract_strided_slice %194 {offsets = [0, 16], sizes = [16, 8], strides = [1, 1]} : vector<16x32xf32> to vector<16x8xf32>
    %cst_67 = arith.constant dense<0.000000e+00> : vector<16x16xf32>
    %228 = tpu.matmul %225, %226, %cst_67 {dimension_numbers = #tpu.dot_dimension_numbers<[1], [1], [0], [0], [0, 0, 1, 0], [], []>} : vector<16x8xf32>, vector<16x8xf32>, vector<16x16xf32> -> vector<16x16xf32>
    %229 = arith.addf %228, %12 : vector<16x16xf32>
    %cst_68 = arith.constant dense<0xFF800000> : vector<16xf32>
    %230 = vector.multi_reduction <maximumf>, %229, %cst_68 [1] : vector<16x16xf32> to vector<16xf32>
    %231 = vector.shape_cast %230 : vector<16xf32> to vector<16x1xf32>
    %232 = vector.broadcast %231 : vector<16x1xf32> to vector<16x16xf32>
    %233 = arith.subf %229, %232 : vector<16x16xf32>
    %234 = math.exp %233 : vector<16x16xf32>
    %cst_69 = arith.constant dense<0.000000e+00> : vector<16xf32>
    %235 = vector.multi_reduction <add>, %234, %cst_69 [1] : vector<16x16xf32> to vector<16xf32>
    %236 = vector.shape_cast %235 : vector<16xf32> to vector<16x1xf32>
    %cst_70 = arith.constant dense<0.000000e+00> : vector<16x8xf32>
    %237 = tpu.matmul %234, %227, %cst_70 {dimension_numbers = #tpu.dot_dimension_numbers<[1], [0], [0], [1], [0, 0, 1, 1], [], []>} : vector<16x16xf32>, vector<16x8xf32>, vector<16x8xf32> -> vector<16x8xf32>
    %238 = vector.broadcast %236 : vector<16x1xf32> to vector<16x8xf32>
    %239 = arith.divf %237, %238 : vector<16x8xf32>
    %240 = vector.extract_strided_slice %192 {offsets = [0, 24], sizes = [16, 8], strides = [1, 1]} : vector<16x32xf32> to vector<16x8xf32>
    %241 = vector.extract_strided_slice %193 {offsets = [0, 24], sizes = [16, 8], strides = [1, 1]} : vector<16x32xf32> to vector<16x8xf32>
    %242 = vector.extract_strided_slice %194 {offsets = [0, 24], sizes = [16, 8], strides = [1, 1]} : vector<16x32xf32> to vector<16x8xf32>
    %cst_71 = arith.constant dense<0.000000e+00> : vector<16x16xf32>
    %243 = tpu.matmul %240, %241, %cst_71 {dimension_numbers = #tpu.dot_dimension_numbers<[1], [1], [0], [0], [0, 0, 1, 0], [], []>} : vector<16x8xf32>, vector<16x8xf32>, vector<16x16xf32> -> vector<16x16xf32>
    %244 = arith.addf %243, %12 : vector<16x16xf32>
    %cst_72 = arith.constant dense<0xFF800000> : vector<16xf32>
    %245 = vector.multi_reduction <maximumf>, %244, %cst_72 [1] : vector<16x16xf32> to vector<16xf32>
    %246 = vector.shape_cast %245 : vector<16xf32> to vector<16x1xf32>
    %247 = vector.broadcast %246 : vector<16x1xf32> to vector<16x16xf32>
    %248 = arith.subf %244, %247 : vector<16x16xf32>
    %249 = math.exp %248 : vector<16x16xf32>
    %cst_73 = arith.constant dense<0.000000e+00> : vector<16xf32>
    %250 = vector.multi_reduction <add>, %249, %cst_73 [1] : vector<16x16xf32> to vector<16xf32>
    %251 = vector.shape_cast %250 : vector<16xf32> to vector<16x1xf32>
    %cst_74 = arith.constant dense<0.000000e+00> : vector<16x8xf32>
    %252 = tpu.matmul %249, %242, %cst_74 {dimension_numbers = #tpu.dot_dimension_numbers<[1], [0], [0], [1], [0, 0, 1, 1], [], []>} : vector<16x16xf32>, vector<16x8xf32>, vector<16x8xf32> -> vector<16x8xf32>
    %253 = vector.broadcast %251 : vector<16x1xf32> to vector<16x8xf32>
    %254 = arith.divf %252, %253 : vector<16x8xf32>
    %255 = tpu.concatenate %209, %224, %239, %254 in 1 : vector<16x8xf32>, vector<16x8xf32>, vector<16x8xf32>, vector<16x8xf32> -> vector<16x32xf32>
    %c1_75 = arith.constant 1 : index
    %c0_76 = arith.constant 0 : index
    %c0_77 = arith.constant 0 : index
    %256 = vector.load %arg2[%c1_75, %c0_76, %c0_77] : memref<2x32x32xf32, #tpu.memory_space<vmem>>, vector<1x32x32xf32>
    %257 = vector.shape_cast %256 : vector<1x32x32xf32> to vector<32x32xf32>
    %cst_78 = arith.constant dense<0.000000e+00> : vector<16x32xf32>
    %258 = tpu.matmul %255, %257, %cst_78 {dimension_numbers = #tpu.dot_dimension_numbers<[1], [0], [0], [1], [0, 0, 1, 1], [], []>} : vector<16x32xf32>, vector<32x32xf32>, vector<16x32xf32> -> vector<16x32xf32>
    %259 = vector.broadcast %161 : vector<1x32xf32> to vector<16x32xf32>
    %260 = arith.addf %258, %259 : vector<16x32xf32>
    %261 = arith.addf %260, %186 : vector<16x32xf32>
    %cst_79 = arith.constant dense<0.000000e+00> : vector<16xf32>
    %262 = vector.multi_reduction <add>, %261, %cst_79 [1] : vector<16x32xf32> to vector<16xf32>
    %263 = vector.shape_cast %262 : vector<16xf32> to vector<16x1xf32>
    %cst_80 = arith.constant 3.200000e+01 : f32
    %264 = vector.broadcast %cst_80 : f32 to vector<16x1xf32>
    %265 = arith.divf %263, %264 : vector<16x1xf32>
    %266 = vector.broadcast %265 : vector<16x1xf32> to vector<16x32xf32>
    %267 = arith.subf %261, %266 : vector<16x32xf32>
    %268 = arith.mulf %267, %267 : vector<16x32xf32>
    %cst_81 = arith.constant dense<0.000000e+00> : vector<16xf32>
    %269 = vector.multi_reduction <add>, %268, %cst_81 [1] : vector<16x32xf32> to vector<16xf32>
    %270 = vector.shape_cast %269 : vector<16xf32> to vector<16x1xf32>
    %cst_82 = arith.constant 3.200000e+01 : f32
    %271 = vector.broadcast %cst_82 : f32 to vector<16x1xf32>
    %272 = arith.divf %270, %271 : vector<16x1xf32>
    %273 = vector.broadcast %265 : vector<16x1xf32> to vector<16x32xf32>
    %274 = arith.subf %261, %273 : vector<16x32xf32>
    %cst_83 = arith.constant 9.99999996E-13 : f32
    %275 = vector.broadcast %cst_83 : f32 to vector<16x1xf32>
    %276 = arith.addf %272, %275 : vector<16x1xf32>
    %277 = math.rsqrt %276 : vector<16x1xf32>
    %278 = vector.broadcast %277 : vector<16x1xf32> to vector<16x32xf32>
    %279 = arith.mulf %274, %278 : vector<16x32xf32>
    %280 = vector.broadcast %159 : vector<1x32xf32> to vector<16x32xf32>
    %281 = arith.mulf %279, %280 : vector<16x32xf32>
    %282 = vector.broadcast %160 : vector<1x32xf32> to vector<16x32xf32>
    %283 = arith.addf %281, %282 : vector<16x32xf32>
    %c1_84 = arith.constant 1 : index
    %c0_85 = arith.constant 0 : index
    %c0_86 = arith.constant 0 : index
    %284 = vector.load %arg3[%c1_84, %c0_85, %c0_86] : memref<2x32x64xf32, #tpu.memory_space<vmem>>, vector<1x32x64xf32>
    %285 = vector.shape_cast %284 : vector<1x32x64xf32> to vector<32x64xf32>
    %cst_87 = arith.constant dense<0.000000e+00> : vector<16x64xf32>
    %286 = tpu.matmul %283, %285, %cst_87 {dimension_numbers = #tpu.dot_dimension_numbers<[1], [0], [0], [1], [0, 0, 1, 1], [], []>} : vector<16x32xf32>, vector<32x64xf32>, vector<16x64xf32> -> vector<16x64xf32>
    %287 = vector.broadcast %163 : vector<1x64xf32> to vector<16x64xf32>
    %288 = arith.addf %286, %287 : vector<16x64xf32>
    %cst_88 = arith.constant 0.000000e+00 : f32
    %289 = vector.broadcast %cst_88 : f32 to vector<16x64xf32>
    %290 = arith.maximumf %288, %289 : vector<16x64xf32>
    %c1_89 = arith.constant 1 : index
    %c0_90 = arith.constant 0 : index
    %c0_91 = arith.constant 0 : index
    %291 = vector.load %arg4[%c1_89, %c0_90, %c0_91] : memref<2x64x32xf32, #tpu.memory_space<vmem>>, vector<1x64x32xf32>
    %292 = vector.shape_cast %291 : vector<1x64x32xf32> to vector<64x32xf32>
    %cst_92 = arith.constant dense<0.000000e+00> : vector<16x32xf32>
    %293 = tpu.matmul %290, %292, %cst_92 {dimension_numbers = #tpu.dot_dimension_numbers<[1], [0], [0], [1], [0, 0, 1, 1], [], []>} : vector<16x64xf32>, vector<64x32xf32>, vector<16x32xf32> -> vector<16x32xf32>
    %294 = vector.broadcast %162 : vector<1x32xf32> to vector<16x32xf32>
    %295 = arith.addf %293, %294 : vector<16x32xf32>
    %296 = arith.addf %295, %283 : vector<16x32xf32>
    %c0_93 = arith.constant 0 : index
    %c0_94 = arith.constant 0 : index
    %297 = vector.load %arg6[%c0_93, %c0_94] : memref<16x32xf32, #tpu.memory_space<vmem>>, vector<16x32xf32>
    tpu.vector_store %arg6[%c0_93, %c0_94], %296 {strides = array<i32>} : memref<16x32xf32, #tpu.memory_space<vmem>>, vector<16x32xf32>,
    return
  }
}

</mosaic_0001>

<bundles_post_ra>
// kernel: transformer_forward.1
= control target key start
LH: loop header
LB: loop body
LE: loop exit
PB: predicated region body
PF: predicated region fallthrough
CT: control target
= control target key end

     0   :  { %vm44_vm0 = vcmask 261120   ;;  %s2334_s0 = inlined_call_operand.vmem [shape: f32[16,32], index: 0, kind: input, shape index: {}]   ;;  %s2335_s1 = inlined_call_operand.vmem [shape: f32[2,32,96], index: 1, kind: input, shape index: {}]   ;;  %s2336_s2 = inlined_call_operand.vmem [shape: f32[2,32,32], index: 2, kind: input, shape index: {}]   ;;  %s2337_s3 = inlined_call_operand.vmem [shape: f32[2,32,64], index: 3, kind: input, shape index: {}]   ;;  %s2338_s4 = inlined_call_operand.vmem [shape: f32[2,64,32], index: 4, kind: input, shape index: {}]   ;;  %s2339_s5 = inlined_call_operand.vmem [shape: f32[2,8,96], index: 5, kind: input, shape index: {}]   ;;  %s2340_s6 = inlined_call_operand.hbm [shape: f32[16,32], index: 6, kind: output, shape index: {}]  }
   0x1   :  { %v24_v0 = vld [vmem:[%s2334_s0] sm:$0xff] }
   0x2   :  { %11 = vsyncpa [#allocation3], 0  ;;  %v45_v1 = vsel %vm44_vm0, %v24_v0, 0.0  ;;  %v25_v2 = vld [vmem:[%s2334_s0 + $0x8] sm:$0xff]  ;;  %v1857_v4 = vmov 32.0   ;;  %v105_v21 = vld [vmem:[%s2335_s1 + $0x18] sm:$0xff] }
   0x3   :  { %46 = vadd.xlane.f32.xlu0 %v45_v1  ;;  %v48_v3 = vsel %vm44_vm0, %v25_v2, 0.0  ;;  %1749 = vrcp.f32 %v1857_v4  ;;  %125 = vmatpush.msra.mxu0 %v105_v21  ;;  %v104_v22 = vld [vmem:[%s2335_s1 + $0x10] sm:$0xff]  ;;  %v103_v23 = vld [vmem:[%s2335_s1 + $0x8] sm:$0xff]  ;;  %v102_v24 = vld [vmem:[%s2335_s1] sm:$0xff]  ;;  %s1858_s10 = smov 88   ;;  %s1859_s11 = smov 80  }
   0x4   :  { %v1941_v36 = vld [vmem:[%s2339_s5] sm:$0xff]  ;;  %s1860_s12 = smov 96   ;;  %s1861_s13 = smov 112   ;;  %vm142_vm8 = vcmask 64512   ;;  %vm174_vm12 = vcmask 130048  }
   0x5   :  { %126 = vmatpush.msra.mxu0 %v104_v22  ;;  %v96_v40 = vperm.slane %v1941_v36, 0  ;;  %v99_v44 = vperm.slane %v1941_v36, 1  ;;  %v106_v54 = vperm.slane %v1941_v36, 7  ;;  %s1862_s14 = smov 72   ;;  %s1863_s15 = smov 56  }
   0x6   :  { %s1864_s16 = smov 120   ;;  %s1865_s17 = smov 64  }
   0x7   :  { %127 = vmatpush.msra.mxu0 %v103_v23  ;;  %s1866_s18 = smov 104   ;;  %s1868_s19 = smov 48  }
   0x8   :  { %s1869_s20 = smov 40   ;;  %s1870_s21 = smov 16  }
   0x9   :  { %v1750_v5 = vpop.eup %1749  ;;  %128 = vmatpush.msra.mxu0 %v102_v24  ;;  %s1871_s22 = smov 8   ;;  %s1872_s23 = smov 24  }
   0xa   :  { %v52_v6 = vmul.f32 32.0, %v1750_v5  ;;  %vm56_vm1 = vweird.f32 %v1750_v5 }
   0xb   :  { %49 = vadd.xlane.f32.xlu0 %v48_v3 }
   0xc   :  { %v53_v7 = vsub.f32 1.0, %v52_v6 }
   0xe   :  { %v54_v8 = vmul.f32 %v1750_v5, %v53_v7 }
  0x10   :  { %v55_v9 = vadd.f32 %v1750_v5, %v54_v8 }
  0x12   :  { %v1918_v10 = vsel %vm56_vm1, %v1750_v5, %v55_v9 }
  0x76   :  { %v47_v11 = vpop.xlane.xlu0 %46 }
  0x77   :  { %v58_v12 = vmul.f32 %v1918_v10, %v47_v11 }
  0x79   :  { %v60_v13 = vsub.f32 %v24_v0, %v58_v12 }
  0x7b   :  { %v62_v14 = vmul.f32 %v60_v13, %v60_v13 }
  0x7d   :  { %v64_v15 = vsel %vm44_vm0, %v62_v14, 0.0 }
  0x7e   :  { %65 = vadd.xlane.f32.xlu1 %v64_v15  ;;  %v50_v16 = vpop.xlane.xlu0 %49 }
  0x7f   :  { %v59_v17 = vmul.f32 %v1918_v10, %v50_v16 }
  0x81   :  { %v61_v18 = vsub.f32 %v25_v2, %v59_v17  ;;  %v26_v17 = vlaneseq }
  0x83   :  { %v63_v19 = vmul.f32 %v61_v18, %v61_v18 }
  0x85   :  { %v67_v20 = vsel %vm44_vm0, %v63_v19, 0.0  ;;  %v30_v19 = vand.u32 127, %v26_v17 }
  0x86   :  { %68 = vadd.xlane.f32.xlu1 %v67_v20 }
  0xf1   :  { %v66_v25 = vpop.xlane.xlu1 %65 }
  0xf2   :  { %v70_v26 = vmul.f32 %v66_v25, %v1918_v10  ;;  %v1867_v25 = vmov -1e+30  }
  0xf4   :  { %v72_v27 = vadd.f32 1e-12, %v70_v26 }
  0xf6   :  { %1751 = vrsqrt.f32 %v72_v27  ;;  %vm80_vm3 = vweird.f32 %v72_v27 }
  0xf9   :  { %v69_v28 = vpop.xlane.xlu1 %68 }
  0xfa   :  { %v71_v29 = vmul.f32 %v69_v28, %v1918_v10 }
  0xfc   :  { %v1752_v30 = vpop.eup %1751  ;;  %v73_v31 = vadd.f32 1e-12, %v71_v29 }
  0xfd   :  { %v75_v32 = vmul.f32 %v1752_v30, %v72_v27  ;;  %vm81_vm2 = vweird.f32 %v1752_v30 }
  0xfe   :  { %1753 = vrsqrt.f32 %v73_v31  ;;  %vm82_vm4 = vmor %vm80_vm3, %vm81_vm2  ;;  %vm90_vm6 = vweird.f32 %v73_v31 }
  0xff   :  { %v76_v33 = vmul.f32 %v1752_v30, %v75_v32 }
 0x101   :  { %v77_v34 = vmul.f32 0.5, %v76_v33 }
 0x103   :  { %v78_v35 = vsub.f32 1.5, %v77_v34 }
 0x104   :  { %v1754_v37 = vpop.eup %1753 }
 0x105   :  { %v79_v38 = vmul.f32 %v1752_v30, %v78_v35  ;;  %v85_v39 = vmul.f32 %v1754_v37, %v73_v31  ;;  %vm91_vm5 = vweird.f32 %v1754_v37 }
 0x106   :  { %vm92_vm7 = vmor %vm90_vm6, %vm91_vm5 }
 0x107   :  { %v83_v41 = vsel %vm82_vm4, %v1752_v30, %v79_v38  ;;  %v86_v42 = vmul.f32 %v1754_v37, %v85_v39 }
 0x108   :  { %v94_v43 = vmul.f32 %v83_v41, %v60_v13 }
 0x109   :  { %v87_v45 = vmul.f32 0.5, %v86_v42 }
 0x10a   :  { %v97_v46 = vmul.f32 %v96_v40, %v94_v43 }
 0x10b   :  { %v88_v47 = vsub.f32 1.5, %v87_v45 }
 0x10c   :  { %v1945_v48 = vadd.f32 %v99_v44, %v97_v46 }
 0x10d   :  { %v89_v49 = vmul.f32 %v1754_v37, %v88_v47 }
 0x10e   :  { %1606 = vmatmul.msk.f32.vlgmr.msra.gmra.mxu0 %vm44_vm0, %v1945_v48 }
 0x10f   :  { %v93_v50 = vsel %vm92_vm7, %v1754_v37, %v89_v49 }
 0x110   :  { %v95_v51 = vmul.f32 %v93_v50, %v61_v18  ;;  %v27_v18 = vshrl.u32 %v26_v17, 7 }
 0x112   :  { %v98_v52 = vmul.f32 %v96_v40, %v95_v51  ;;  %v31_v20 = vxor.u32 %v30_v19, %v27_v18  ;;  %v28_v22 = vadd.s32 8, %v27_v18  ;;  %vm37_vm10 = vcmp.le.s32.totalorder %v30_v19, %v27_v18 }
 0x114   :  { %v1949_v53 = vadd.f32 %v99_v44, %v98_v52  ;;  %v33_v21 = vand.u32 1, %v31_v20  ;;  %v32_v23 = vxor.u32 %v30_v19, %v28_v22  ;;  %vm38_vm14 = vcmp.le.s32.totalorder %v30_v19, %v28_v22 }
 0x116   :  { %1607 = vmatmul.msk.f32.gmra.mxu0 %vm44_vm0, %v1949_v53  ;;  %vm35_vm9 = vcmp.eq.s32.totalorder %v33_v21, 0  ;;  %v34_v24 = vand.u32 1, %v32_v23 }
 0x117   :  { %vm39_vm11 = vmand %vm35_vm9, %vm37_vm10 }
 0x118   :  { %v1990_v26 = vsel %vm39_vm11, 0.0, %v1867_v25  ;;  %vm36_vm13 = vcmp.eq.s32.totalorder %v34_v24, 0 }
 0x119   :  { %vm40_vm15 = vmand %vm36_vm13, %vm38_vm14 }
 0x11a   :  { %v1994_v30 = vsel %vm40_vm15, 0.0, %v1867_v25 }
 0x18b   :  { %v130_v55 = vpop.f32.mrf.mxu0 }
 0x18c   :  { %v131_v56 = vadd.f32 %v130_v55, %v106_v54 }
 0x18e   :  { %262 = vrot.lane.b32.xlu1 %v131_v56, %s1858_s10 }
 0x193   :  { %v133_v57 = vpop.f32.mrf.mxu0 }
 0x194   :  { %v134_v58 = vadd.f32 %v133_v57, %v106_v54 }
 0x196   :  { %386 = vrot.lane.b32.xlu1 %v134_v58, %s1859_s11  ;;  %264 = vrot.lane.b32.xlu0 %v134_v58, %s1858_s10  ;;  %v1961_v59 = vpack.i.bf16 %v131_v56, %v134_v58 }
 0x197   :  { %140 = vrot.lane.b32.xlu2 %v134_v58, %s1860_s12 }
 0x19e   :  { %380 = vrot.lane.b32.xlu1 %v131_v56, %s1861_s13  ;;  %506 = vrot.lane.b32.xlu0 %v131_v56, %s1862_s14 }
 0x19f   :  { %138 = vrot.lane.b32.xlu2 %v131_v56, %s1860_s12 }
 0x1a6   :  { %1715 = vrot.lane.b32.xlu1 %v1961_v59, %s1863_s15  ;;  %384 = vrot.lane.b32.xlu0 %v131_v56, %s1859_s11 }
 0x1a7   :  { %258 = vrot.lane.b32.xlu2 %v131_v56, %s1864_s16 }
 0x1ae   :  { %382 = vrot.lane.b32.xlu0 %v134_v58, %s1861_s13 }
 0x1af   :  { %260 = vrot.lane.b32.xlu2 %v134_v58, %s1864_s16 }
 0x1b6   :  { %1710 = vrot.lane.b32.xlu0 %v1961_v59, %s1865_s17 }
 0x1b7   :  { %508 = vrot.lane.b32.xlu2 %v134_v58, %s1862_s14 }
 0x1bf   :  { %502 = vrot.lane.b32.xlu2 %v131_v56, %s1866_s18 }
 0x1c7   :  { %504 = vrot.lane.b32.xlu2 %v134_v58, %s1866_s18 }
 0x1f1   :  { %v141_v60 = vpop.permute.xlu2 %140 }
 0x1f2   :  { %1608 = vmatpush.xpose.msk.msra.mxu1 %vm142_vm8, %v141_v60 }
 0x1f9   :  { %v139_v61 = vpop.permute.xlu2 %138 }
 0x1fa   :  { %1609 = vmatpush.xpose.msk.msra.mxu1 %vm142_vm8, %v139_v61 }
 0x1fd   :  { %1610 = vmatmul.msk.f32.vlgmr.msra.gmra.mxu1 %vm142_vm8, %v131_v56 }
 0x200   :  { %v263_v62 = vpop.permute.xlu1 %262 }
 0x201   :  { %v259_v63 = vpop.permute.xlu2 %258 }
 0x205   :  { %1611 = vmatmul.msk.f32.gmra.mxu1 %vm142_vm8, %v134_v58 }
 0x208   :  { %v265_v0 = vpop.permute.xlu0 %264  ;;  %v387_v1 = vpop.permute.xlu1 %386 }
 0x209   :  { %v261_v2 = vpop.permute.xlu2 %260  ;;  %1614 = vmatpush.xpose.msk.msra.mxu3 %vm142_vm8, %v265_v0  ;;  %1620 = vmatpush.xpose.msk.msrb.mxu0 %vm142_vm8, %v387_v1 }
 0x20d   :  { %1615 = vmatpush.xpose.msk.msra.mxu3 %vm142_vm8, %v263_v62 }
 0x210   :  { %v507_v3 = vpop.permute.xlu0 %506  ;;  %1616 = vmatmul.msk.f32.vlgmr.msra.gmra.mxu3 %vm142_vm8, %v259_v63  ;;  %v381_v6 = vpop.permute.xlu1 %380 }
 0x211   :  { %v509_v4 = vpop.permute.xlu2 %508 }
 0x212   :  { %1626 = vmatpush.xpose.msk.msrb.mxu3 %vm142_vm8, %v509_v4 }
 0x216   :  { %1627 = vmatpush.xpose.msk.msrb.mxu3 %vm142_vm8, %v507_v3 }
 0x218   :  { %v385_v5 = vpop.permute.xlu0 %384  ;;  %1617 = vmatmul.msk.f32.gmra.mxu3 %vm142_vm8, %v261_v2  ;;  %v1716_v12 = vpop.permute.xlu1 %1715 }
 0x219   :  { %1621 = vmatpush.xpose.msk.msrb.mxu0 %vm142_vm8, %v385_v5  ;;  %v503_v7 = vpop.permute.xlu2 %502  ;;  %v1717_v15 = vunpack.i.l.bf16 %v1716_v12  ;;  %v1718_v16 = vunpack.i.h.bf16 %v1716_v12 }
 0x21c   :  { %1622 = vmatmul.msk.f32.vlgmr.msrb.gmra.mxu0 %vm142_vm8, %v381_v6 }
 0x220   :  { %v383_v8 = vpop.permute.xlu0 %382  ;;  %1628 = vmatmul.msk.f32.vlgmr.msrb.gmra.mxu3 %vm142_vm8, %v503_v7 }
 0x221   :  { %v505_v9 = vpop.permute.xlu2 %504 }
 0x224   :  { %1623 = vmatmul.msk.f32.gmra.mxu0 %vm142_vm8, %v383_v8 }
 0x228   :  { %v1711_v11 = vpop.permute.xlu0 %1710  ;;  %1629 = vmatmul.msk.f32.gmra.mxu3 %vm142_vm8, %v505_v9 }
 0x229   :  { %v1712_v13 = vunpack.i.l.bf16 %v1711_v11  ;;  %v1713_v14 = vunpack.i.h.bf16 %v1711_v11 }
 0x22b   :  { %219 = vmatpush.msra.mxu2 %v1712_v13 }
 0x22d   :  { %220 = vmatpush.msra.mxu2 %v1713_v14 }
 0x22f   :  { %341 = vmatpush.msrb.mxu2 %v1717_v15 }
 0x231   :  { %342 = vmatpush.msrb.mxu2 %v1718_v16 }
 0x27a   :  { %v168_v27 = vpop.f32.mrf.mxu1 }
 0x27b   :  { %v169_v28 = vadd.f32 %v168_v27, %v1990_v26 }
 0x27d   :  { %v175_v29 = vsel %vm174_vm12, %v169_v28, -inf }
 0x27e   :  { %176 = vmax.xlane.f32.xlu2 %v175_v29 }
 0x282   :  { %v171_v31 = vpop.f32.mrf.mxu1 }
 0x283   :  { %v172_v32 = vadd.f32 %v171_v31, %v1994_v30 }
 0x285   :  { %v178_v33 = vsel %vm174_vm12, %v172_v32, -inf }
 0x286   :  { %179 = vmax.xlane.f32.xlu1 %v178_v33 }
 0x293   :  { %v291_v34 = vpop.f32.mrf.mxu3 }
 0x294   :  { %v292_v42 = vadd.f32 %v291_v34, %v1990_v26 }
 0x296   :  { %v297_v45 = vsel %vm174_vm12, %v292_v42, -inf }
 0x299   :  { %v413_v35 = vpop.f32.mrf.mxu0 }
 0x29a   :  { %v414_v37 = vadd.f32 %v413_v35, %v1990_v26 }
 0x29b   :  { %v294_v38 = vpop.f32.mrf.mxu3 }
 0x29c   :  { %v295_v39 = vadd.f32 %v294_v38, %v1994_v30  ;;  %v419_v40 = vsel %vm174_vm12, %v414_v37, -inf }
 0x29d   :  { %420 = vmax.xlane.f32.xlu0 %v419_v40 }
 0x29e   :  { %v300_v41 = vsel %vm174_vm12, %v295_v39, -inf }
 0x29f   :  { %1725 = vrot.lane.b32.xlu1 %v1961_v59, %s1868_s19  ;;  %301 = vmax.xlane.f32.xlu2 %v300_v41 }
 0x2a1   :  { %v416_v51 = vpop.f32.mrf.mxu0 }
 0x2a2   :  { %v417_v52 = vadd.f32 %v416_v51, %v1994_v30 }
 0x2a3   :  { %v535_v43 = vpop.f32.mrf.mxu3 }
 0x2a4   :  { %v536_v44 = vadd.f32 %v535_v43, %v1990_v26  ;;  %v422_v54 = vsel %vm174_vm12, %v417_v52, -inf }
 0x2a5   :  { %298 = vmax.xlane.f32.xlu0 %v297_v45 }
 0x2a6   :  { %v541_v46 = vsel %vm174_vm12, %v536_v44, -inf }
 0x2a7   :  { %542 = vmax.xlane.f32.xlu2 %v541_v46 }
 0x2ab   :  { %v538_v47 = vpop.f32.mrf.mxu3 }
 0x2ac   :  { %v2009_v49 = vadd.f32 %v538_v47, %v1994_v30 }
 0x2ae   :  { %v544_v50 = vsel %vm174_vm12, %v2009_v49, -inf }
 0x2af   :  { %545 = vmax.xlane.f32.xlu2 %v544_v50 }
 0x2b7   :  { %423 = vmax.xlane.f32.xlu2 %v422_v54 }
 0x2b9   :  { %1720 = vrot.lane.b32.xlu0 %v1961_v59, %s1869_s20 }
 0x2f1   :  { %v177_v55 = vpop.xlane.xlu2 %176 }
 0x2f2   :  { %v181_v56 = vsub.f32 %v169_v28, %v177_v55 }
 0x2f4   :  { %v183_v57 = vmul.f32 1.442695, %v181_v56 }
 0x2f6   :  { %1755 = vpow2.f32 %v183_v57 }
 0x2f9   :  { %v180_v58 = vpop.xlane.xlu1 %179 }
 0x2fa   :  { %v182_v60 = vsub.f32 %v172_v32, %v180_v58 }
 0x2fc   :  { %v2017_v61 = vpop.eup %1755  ;;  %v185_v62 = vmul.f32 1.442695, %v182_v60 }
 0x2fd   :  { %1612 = vmatmul.msk.f32.vlgmr.msra.gmra.mxu2 %vm174_vm12, %v2017_v61 }
 0x2fe   :  { %1757 = vpow2.f32 %v185_v62 }
 0x304   :  { %v1758_v63 = vpop.eup %1757 }
 0x305   :  { %1613 = vmatmul.msk.f32.gmra.mxu2 %vm174_vm12, %v1758_v63  ;;  %v190_v40 = vsel %vm174_vm12, %v1758_v63, 0.0 }
 0x310   :  { %v421_v0 = vpop.xlane.xlu0 %420 }
 0x311   :  { %v425_v1 = vsub.f32 %v414_v37, %v421_v0  ;;  %v1726_v2 = vpop.permute.xlu1 %1725 }
 0x312   :  { %v302_v59 = vpop.xlane.xlu2 %301  ;;  %v1727_v3 = vunpack.i.l.bf16 %v1726_v2  ;;  %v1728_v6 = vunpack.i.h.bf16 %v1726_v2 }
 0x313   :  { %v427_v4 = vmul.f32 1.442695, %v425_v1  ;;  %v304_v5 = vsub.f32 %v295_v39, %v302_v59  ;;  %v187_v39 = vsel %vm174_vm12, %v2017_v61, 0.0 }
 0x314   :  { %463 = vmatpush.msrb.mxu1 %v1727_v3 }
 0x315   :  { %1759 = vpow2.f32 %v427_v4  ;;  %v307_v7 = vmul.f32 1.442695, %v304_v5 }
 0x316   :  { %464 = vmatpush.msrb.mxu1 %v1728_v6 }
 0x317   :  { %1761 = vpow2.f32 %v307_v7 }
 0x318   :  { %v299_v8 = vpop.xlane.xlu0 %298 }
 0x319   :  { %v303_v9 = vsub.f32 %v292_v42, %v299_v8 }
 0x31a   :  { %v543_v11 = vpop.xlane.xlu2 %542 }
 0x31b   :  { %v1760_v12 = vpop.eup %1759  ;;  %v305_v13 = vmul.f32 1.442695, %v303_v9  ;;  %v547_v20 = vsub.f32 %v536_v44, %v543_v11 }
 0x31c   :  { %1624 = vmatmul.msk.f32.vlgmr.msrb.gmra.mxu1 %vm174_vm12, %v1760_v12  ;;  %v431_v14 = vsel %vm174_vm12, %v1760_v12, 0.0 }
 0x31d   :  { %v1762_v15 = vpop.eup %1761  ;;  %1763 = vpow2.f32 %v305_v13  ;;  %432 = vadd.xlane.f32.xlu1 %v431_v14  ;;  %v549_v21 = vmul.f32 1.442695, %v547_v20 }
 0x31e   :  { %v312_v16 = vsel %vm174_vm12, %v1762_v15, 0.0 }
 0x31f   :  { %313 = vadd.xlane.f32.xlu0 %v312_v16  ;;  %1765 = vpow2.f32 %v549_v21 }
 0x322   :  { %v546_v17 = vpop.xlane.xlu2 %545 }
 0x323   :  { %v1764_v18 = vpop.eup %1763  ;;  %v548_v27 = vsub.f32 %v2009_v49, %v546_v17 }
 0x324   :  { %1618 = vmatmul.msk.f32.vlgmr.msrb.gmra.mxu2 %vm174_vm12, %v1764_v18  ;;  %v309_v19 = vsel %vm174_vm12, %v1764_v18, 0.0 }
 0x325   :  { %310 = vadd.xlane.f32.xlu2 %v309_v19  ;;  %v551_v31 = vmul.f32 1.442695, %v548_v27  ;;  %v1766_v32 = vpop.eup %1765 }
 0x326   :  { %v553_v37 = vsel %vm174_vm12, %v1766_v32, 0.0 }
 0x32a   :  { %v424_v22 = vpop.xlane.xlu2 %423 }
 0x32b   :  { %v426_v23 = vsub.f32 %v417_v52, %v424_v22  ;;  %v1721_v24 = vpop.permute.xlu0 %1720 }
 0x32c   :  { %v1722_v25 = vunpack.i.l.bf16 %v1721_v24  ;;  %1619 = vmatmul.msk.f32.gmra.mxu2 %vm174_vm12, %v1762_v15  ;;  %v1723_v29 = vunpack.i.h.bf16 %v1721_v24 }
 0x32d   :  { %v429_v28 = vmul.f32 1.442695, %v426_v23 }
 0x32e   :  { %585 = vmatpush.msra.mxu2 %v1722_v25 }
 0x32f   :  { %1767 = vpow2.f32 %v429_v28 }
 0x330   :  { %586 = vmatpush.msra.mxu2 %v1723_v29  ;;  %1769 = vpow2.f32 %v551_v31 }
 0x334   :  { %1630 = vmatmul.msk.f32.vlgmr.msra.gmra.mxu2 %vm174_vm12, %v1766_v32 }
 0x335   :  { %v1768_v33 = vpop.eup %1767 }
 0x336   :  { %1625 = vmatmul.msk.f32.gmra.mxu1 %vm174_vm12, %v1768_v33  ;;  %v434_v34 = vsel %vm174_vm12, %v1768_v33, 0.0  ;;  %v1770_v35 = vpop.eup %1769 }
 0x337   :  { %435 = vadd.xlane.f32.xlu2 %v434_v34  ;;  %v556_v38 = vsel %vm174_vm12, %v1770_v35, 0.0 }
 0x33c   :  { %1631 = vmatmul.msk.f32.gmra.mxu2 %vm174_vm12, %v1770_v35 }
 0x33f   :  { %554 = vadd.xlane.f32.xlu2 %v553_v37 }
 0x347   :  { %557 = vadd.xlane.f32.xlu2 %v556_v38 }
 0x34f   :  { %188 = vadd.xlane.f32.xlu2 %v187_v39 }
 0x357   :  { %191 = vadd.xlane.f32.xlu2 %v190_v40 }
 0x380   :  { %v2038_v43 = vpop.f32.mrf.mxu2 }
 0x388   :  { %v2040_v57 = vpop.f32.mrf.mxu2 }
 0x390   :  { %v433_v41 = vpop.xlane.xlu1 %432 }
 0x391   :  { %1771 = vrcp.f32 %v433_v41  ;;  %v483_v50 = vand.u32 2147483648, %v433_v41  ;;  %v481_v52 = vand.u32 2147483647, %v433_v41  ;;  %vm477_vm2 = vweird.f32 %v433_v41 }
 0x392   :  { %v314_v42 = vpop.xlane.xlu0 %313 }
 0x393   :  { %1773 = vrcp.f32 %v314_v42  ;;  %v484_v58 = vor.u32 1.1754944e-38, %v483_v50  ;;  %vm482_vm4 = vcmp.eq.f32.partialorder %v481_v52, 8.507059e+37  ;;  %v376_v15 = vand.u32 2147483648, %v314_v42 }
 0x394   :  { %vm370_vm11 = vweird.f32 %v314_v42  ;;  %v374_v16 = vand.u32 2147483647, %v314_v42 }
 0x395   :  { %v377_v19 = vor.u32 1.1754944e-38, %v376_v15 }
 0x396   :  { %vm375_vm14 = vcmp.eq.f32.partialorder %v374_v16, 8.507059e+37 }
 0x397   :  { %v1772_v44 = vpop.eup %1771 }
 0x398   :  { %v473_v45 = vmul.f32 %v1772_v44, %v433_v41  ;;  %v311_v46 = vpop.xlane.xlu2 %310  ;;  %vm478_vm1 = vweird.f32 %v1772_v44 }
 0x399   :  { %1775 = vrcp.f32 %v311_v46  ;;  %v1774_v49 = vpop.eup %1773  ;;  %vm479_vm3 = vmor %vm477_vm2, %vm478_vm1  ;;  %v466_v62 = vpop.f32.mrf.mxu1  ;;  %v361_v59 = vand.u32 2147483648, %v311_v46  ;;  %v359_v4 = vand.u32 2147483647, %v311_v46  ;;  %vm355_vm6 = vweird.f32 %v311_v46 }
 0x39a   :  { %v474_v47 = vsub.f32 1.0, %v473_v45  ;;  %v366_v54 = vmul.f32 %v1774_v49, %v314_v42  ;;  %vm371_vm10 = vweird.f32 %v1774_v49 }
 0x39b   :  { %v362_v8 = vor.u32 1.1754944e-38, %v361_v59  ;;  %vm360_vm9 = vcmp.eq.f32.partialorder %v359_v4, 8.507059e+37  ;;  %vm372_vm13 = vmor %vm370_vm11, %vm371_vm10  ;;  %v657_v4 = vld [vmem:[%s2336_s2 + $0x10] sm:$0xff] }
 0x39c   :  { %v475_v51 = vmul.f32 %v1772_v44, %v474_v47  ;;  %v367_v0 = vsub.f32 1.0, %v366_v54 }
 0x39e   :  { %v476_v55 = vadd.f32 %v1772_v44, %v475_v51  ;;  %v368_v6 = vmul.f32 %v1774_v49, %v367_v0 }
 0x39f   :  { %v1776_v56 = vpop.eup %1775 }
 0x3a0   :  { %v351_v60 = vmul.f32 %v1776_v56, %v311_v46  ;;  %v480_v61 = vsel %vm479_vm3, %v1772_v44, %v476_v55  ;;  %vm356_vm5 = vweird.f32 %v1776_v56  ;;  %v369_v14 = vadd.f32 %v1774_v49, %v368_v6 }
 0x3a1   :  { %v485_v63 = vsel %vm482_vm4, %v484_v58, %v480_v61  ;;  %vm357_vm7 = vmor %vm355_vm6, %vm356_vm5 }
 0x3a2   :  { %v352_v1 = vsub.f32 1.0, %v351_v60  ;;  %v486_v2 = vmul.f32 %v485_v63, %v466_v62  ;;  %v373_v17 = vsel %vm372_vm13, %v1774_v49, %v369_v14 }
 0x3a3   :  { %v378_v20 = vsel %vm375_vm14, %v377_v19, %v373_v17 }
 0x3a4   :  { %634 = vrot.lane.b32.xlu2 %v486_v2, %s1870_s21  ;;  %v353_v3 = vmul.f32 %v1776_v56, %v352_v1 }
 0x3a6   :  { %v354_v5 = vadd.f32 %v1776_v56, %v353_v3  ;;  %v658_v3 = vld [vmem:[%s2336_s2 + $0x18] sm:$0xff] }
 0x3a7   :  { %v344_v7 = vpop.f32.mrf.mxu2  ;;  %678 = vmatpush.msra.mxu0 %v658_v3  ;;  %v743_v3 = vld [vmem:[%s2337_s3 + $0x10] sm:$0xff] }
 0x3a8   :  { %v358_v9 = vsel %vm357_vm7, %v1776_v56, %v354_v5  ;;  %v656_v5 = vld [vmem:[%s2336_s2 + $0x8] sm:$0xff] }
 0x3a9   :  { %v363_v11 = vsel %vm360_vm9, %v362_v8, %v358_v9  ;;  %679 = vmatpush.msra.mxu0 %v657_v4  ;;  %v742_v4 = vld [vmem:[%s2337_s3 + $0x8] sm:$0xff] }
 0x3aa   :  { %v364_v12 = vmul.f32 %v363_v11, %v344_v7  ;;  %v436_v13 = vpop.xlane.xlu2 %435  ;;  %v655_v7 = vld [vmem:[%s2336_s2] sm:$0xff] }
 0x3ab   :  { %1777 = vrcp.f32 %v436_v13  ;;  %v498_v45 = vand.u32 2147483648, %v436_v13  ;;  %vm492_vm5 = vweird.f32 %v436_v13  ;;  %v496_v47 = vand.u32 2147483647, %v436_v13  ;;  %680 = vmatpush.msra.mxu0 %v656_v5  ;;  %v741_v5 = vld [vmem:[%s2337_s3] sm:$0xff] }
 0x3ac   :  { %626 = vrot.lane.b32.xlu1 %v364_v12, %s1871_s22 }
 0x3ad   :  { %v499_v56 = vor.u32 1.1754944e-38, %v498_v45  ;;  %vm497_vm9 = vcmp.eq.f32.partialorder %v496_v47, 8.507059e+37  ;;  %681 = vmatpush.msra.mxu0 %v655_v7  ;;  %v659_v47 = vperm.slane %v1941_v36, 4 }
 0x3af   :  { %v347_v18 = vpop.f32.mrf.mxu2 }
 0x3b0   :  { %v379_v21 = vmul.f32 %v378_v20, %v347_v18 }
 0x3b1   :  { %v1778_v23 = vpop.eup %1777 }
 0x3b2   :  { %v555_v22 = vpop.xlane.xlu2 %554  ;;  %v488_v24 = vmul.f32 %v1778_v23, %v436_v13  ;;  %vm493_vm2 = vweird.f32 %v1778_v23 }
 0x3b3   :  { %1779 = vrcp.f32 %v555_v22  ;;  %v605_v32 = vand.u32 2147483648, %v555_v22  ;;  %v603_v35 = vand.u32 2147483647, %v555_v22  ;;  %vm599_vm1 = vweird.f32 %v555_v22  ;;  %vm494_vm6 = vmor %vm492_vm5, %vm493_vm2  ;;  %v469_v63 = vpop.f32.mrf.mxu1 }
 0x3b4   :  { %628 = vrot.lane.b32.xlu1 %v379_v21, %s1871_s22  ;;  %v489_v27 = vsub.f32 1.0, %v488_v24  ;;  %vm652_vm5 = vcmask 195584  }
 0x3b5   :  { %v606_v40 = vor.u32 1.1754944e-38, %v605_v32  ;;  %vm604_vm4 = vcmp.eq.f32.partialorder %v603_v35, 8.507059e+37 }
 0x3b6   :  { %v490_v33 = vmul.f32 %v1778_v23, %v489_v27 }
 0x3b7   :  { %v588_v39 = vpop.f32.mrf.mxu2 }
 0x3b8   :  { %v491_v41 = vadd.f32 %v1778_v23, %v490_v33 }
 0x3b9   :  { %v1780_v25 = vpop.eup %1779 }
 0x3ba   :  { %v595_v28 = vmul.f32 %v1780_v25, %v555_v22  ;;  %v558_v29 = vpop.xlane.xlu2 %557  ;;  %vm600_vm15 = vweird.f32 %v1780_v25  ;;  %v495_v52 = vsel %vm494_vm6, %v1778_v23, %v491_v41 }
 0x3bb   :  { %1781 = vrcp.f32 %v558_v29  ;;  %vm601_vm3 = vmor %vm599_vm1, %vm600_vm15  ;;  %v620_v51 = vand.u32 2147483648, %v558_v29  ;;  %v618_v55 = vand.u32 2147483647, %v558_v29  ;;  %vm614_vm10 = vweird.f32 %v558_v29 }
 0x3bc   :  { %v596_v31 = vsub.f32 1.0, %v595_v28  ;;  %v500_v60 = vsel %vm497_vm9, %v499_v56, %v495_v52 }
 0x3bd   :  { %v621_v61 = vor.u32 1.1754944e-38, %v620_v51  ;;  %vm619_vm13 = vcmp.eq.f32.partialorder %v618_v55, 8.507059e+37  ;;  %v501_v2 = vmul.f32 %v500_v60, %v469_v63 }
 0x3be   :  { %v597_v34 = vmul.f32 %v1780_v25, %v596_v31 }
 0x3bf   :  { %v591_v0 = vpop.f32.mrf.mxu2 }
 0x3c0   :  { %v598_v37 = vadd.f32 %v1780_v25, %v597_v34 }
 0x3c1   :  { %v1782_v38 = vpop.eup %1781 }
 0x3c2   :  { %v602_v42 = vsel %vm601_vm3, %v1780_v25, %v598_v37  ;;  %v610_v44 = vmul.f32 %v1782_v38, %v558_v29  ;;  %vm615_vm7 = vweird.f32 %v1782_v38  ;;  %v189_v6 = vpop.xlane.xlu2 %188 }
 0x3c3   :  { %v607_v46 = vsel %vm604_vm4, %v606_v40, %v602_v42  ;;  %vm616_vm11 = vmor %vm614_vm10, %vm615_vm7  ;;  %1783 = vrcp.f32 %v189_v6  ;;  %v239_v17 = vand.u32 2147483648, %v189_v6  ;;  %vm233_vm15 = vweird.f32 %v189_v6 }
 0x3c4   :  { %v608_v49 = vmul.f32 %v607_v46, %v588_v39  ;;  %v611_v50 = vsub.f32 1.0, %v610_v44  ;;  %v237_v18 = vand.u32 2147483647, %v189_v6 }
 0x3c5   :  { %v240_v21 = vor.u32 1.1754944e-38, %v239_v17 }
 0x3c6   :  { %v612_v54 = vmul.f32 %v1782_v38, %v611_v50  ;;  %642 = vrot.lane.b32.xlu0 %v608_v49, %s1872_s23  ;;  %vm238_vm2 = vcmp.eq.f32.partialorder %v237_v18, 8.507059e+37 }
 0x3c8   :  { %v613_v58 = vadd.f32 %v1782_v38, %v612_v54 }
 0x3c9   :  { %v1784_v8 = vpop.eup %1783 }
 0x3ca   :  { %v617_v62 = vsel %vm616_vm11, %v1782_v38, %v613_v58  ;;  %v192_v9 = vpop.xlane.xlu2 %191  ;;  %v229_v11 = vmul.f32 %v1784_v8, %v189_v6  ;;  %vm234_vm14 = vweird.f32 %v1784_v8 }
 0x3cb   :  { %v622_v1 = vsel %vm619_vm13, %v621_v61, %v617_v62  ;;  %1785 = vrcp.f32 %v192_v9  ;;  %vm235_vm1 = vmor %vm233_vm15, %vm234_vm14  ;;  %v254_v28 = vand.u32 2147483648, %v192_v9  ;;  %vm248_vm4 = vweird.f32 %v192_v9 }
 0x3cc   :  { %v623_v59 = vmul.f32 %v622_v1, %v591_v0  ;;  %v230_v12 = vsub.f32 1.0, %v229_v11  ;;  %v252_v31 = vand.u32 2147483647, %v192_v9  ;;  %v783_v11 = vld [vmem:[%s2338_s4 + $0x30] sm:$0xff] }
 0x3cd   :  { %v255_v37 = vor.u32 1.1754944e-38, %v254_v28 }
 0x3ce   :  { %636 = vrot.lane.b32.xlu0 %v501_v2, %s1870_s21  ;;  %644 = vrot.lane.b32.xlu2 %v623_v59, %s1872_s23  ;;  %v231_v14 = vmul.f32 %v1784_v8, %v230_v12  ;;  %vm253_vm7 = vcmp.eq.f32.partialorder %v252_v31, 8.507059e+37  ;;  %v782_v12 = vld [vmem:[%s2338_s4 + $0x28] sm:$0xff] }
 0x3d0   :  { %v232_v16 = vadd.f32 %v1784_v8, %v231_v14 }
 0x3d1   :  { %v1786_v13 = vpop.eup %1785 }
 0x3d2   :  { %v244_v15 = vmul.f32 %v1786_v13, %v192_v9  ;;  %v236_v20 = vsel %vm235_vm1, %v1784_v8, %v232_v16  ;;  %vm249_vm3 = vweird.f32 %v1786_v13  ;;  %v784_v9 = vld [vmem:[%s2338_s4 + $0x38] sm:$0xff]  ;;  %vm786_vm1 = vcmask 523264  }
 0x3d3   :  { %v241_v23 = vsel %vm238_vm2, %v240_v21, %v236_v20  ;;  %vm250_vm6 = vmor %vm248_vm4, %vm249_vm3  ;;  %801 = vmatpush.msra.mxu3 %v784_v9  ;;  %v1640_v9 = vld [vmem:[%s2335_s1 + $0x28] sm:$0xff] }
 0x3d4   :  { %v245_v19 = vsub.f32 1.0, %v244_v15  ;;  %v242_v25 = vmul.f32 %v241_v23, %v2038_v43  ;;  %v781_v15 = vld [vmem:[%s2338_s4 + $0x20] sm:$0xff] }
 0x3d5   :  { %802 = vmatpush.msra.mxu3 %v783_v11  ;;  %v1639_v11 = vld [vmem:[%s2335_s1 + $0x20] sm:$0xff] }
 0x3d6   :  { %v246_v22 = vmul.f32 %v1786_v13, %v245_v19  ;;  %v780_v19 = vld [vmem:[%s2338_s4 + $0x18] sm:$0xff] }
 0x3d7   :  { %803 = vmatpush.msra.mxu3 %v782_v12 }
 0x3d8   :  { %v247_v27 = vadd.f32 %v1786_v13, %v246_v22 }
 0x3d9   :  { %804 = vmatpush.msra.mxu3 %v781_v15 }
 0x3da   :  { %v251_v33 = vsel %vm250_vm6, %v1786_v13, %v247_v27 }
 0x3db   :  { %v256_v43 = vsel %vm253_vm7, %v255_v37, %v251_v33  ;;  %805 = vmatpush.msra.mxu3 %v780_v19 }
 0x3dc   :  { %v257_v40 = vmul.f32 %v256_v43, %v2040_v57 }
 0x3fe   :  { %v635_v32 = vpop.permute.xlu2 %634 }
 0x41e   :  { %v627_v24 = vpop.permute.xlu1 %626 }
 0x41f   :  { %v648_v29 = vsel %vm142_vm8, %v242_v25, %v627_v24  ;;  %v735_v25 = vperm.slane %v1941_v36, 2 }
 0x420   :  { %v650_v34 = vsel %vm174_vm12, %v648_v29, %v635_v32  ;;  %v738_v32 = vperm.slane %v1941_v36, 3 }
 0x426   :  { %v629_v39 = vpop.permute.xlu1 %628 }
 0x427   :  { %v649_v41 = vsel %vm142_vm8, %v257_v40, %v629_v39 }
 0x428   :  { %v645_v44 = vpop.permute.xlu2 %644 }
 0x438   :  { %v643_v35 = vpop.permute.xlu0 %642 }
 0x439   :  { %v653_v38 = vsel %vm652_vm5, %v650_v34, %v643_v35 }
 0x43a   :  { %1632 = vmatmul.msk.f32.vlgmr.msra.gmra.mxu0 %vm44_vm0, %v653_v38 }
 0x440   :  { %v637_v42 = vpop.permute.xlu0 %636 }
 0x441   :  { %v651_v45 = vsel %vm174_vm12, %v649_v41, %v637_v42  ;;  %v779_v42 = vld [vmem:[%s2338_s4 + $0x10] sm:$0xff] }
 0x442   :  { %v654_v46 = vsel %vm652_vm5, %v651_v45, %v645_v44  ;;  %806 = vmatpush.msra.mxu3 %v779_v42  ;;  %v778_v44 = vld [vmem:[%s2338_s4 + $0x8] sm:$0xff]  ;;  %v777_v45 = vld [vmem:[%s2338_s4] sm:$0xff] }
 0x443   :  { %1633 = vmatmul.msk.f32.gmra.mxu0 %vm44_vm0, %v654_v46  ;;  %v745_v46 = vperm.slane %v1941_v36, 6 }
 0x444   :  { %807 = vmatpush.msra.mxu3 %v778_v44 }
 0x446   :  { %808 = vmatpush.msra.mxu3 %v777_v45 }
 0x4b7   :  { %v683_v49 = vpop.f32.mrf.mxu0 }
 0x4b8   :  { %v684_v50 = vadd.f32 %v683_v49, %v659_v47 }
 0x4ba   :  { %v689_v51 = vadd.f32 %v684_v50, %v1945_v48 }
 0x4bc   :  { %v691_v52 = vsel %vm44_vm0, %v689_v51, 0.0 }
 0x4bd   :  { %692 = vadd.xlane.f32.xlu1 %v691_v52 }
 0x4c0   :  { %v686_v57 = vpop.f32.mrf.mxu0 }
 0x4c1   :  { %v687_v54 = vadd.f32 %v686_v57, %v659_v47 }
 0x4c3   :  { %v690_v55 = vadd.f32 %v687_v54, %v1949_v53  ;;  %v744_v53 = vld [vmem:[%s2337_s3 + $0x18] sm:$0xff]  ;;  %v785_v54 = vperm.slane %v1941_v36, 5 }
 0x4c4   :  { %764 = vmatpush.msra.mxu1 %v744_v53 }
 0x4c5   :  { %v694_v56 = vsel %vm44_vm0, %v690_v55, 0.0 }
 0x4c6   :  { %695 = vadd.xlane.f32.xlu0 %v694_v56  ;;  %765 = vmatpush.msra.mxu1 %v743_v3 }
 0x4c8   :  { %766 = vmatpush.msra.mxu1 %v742_v4 }
 0x4ca   :  { %767 = vmatpush.msra.mxu1 %v741_v5 }
 0x530   :  { %v693_v58 = vpop.xlane.xlu1 %692 }
 0x531   :  { %v697_v60 = vmul.f32 %v693_v58, %v1918_v10 }
 0x533   :  { %v699_v61 = vsub.f32 %v689_v51, %v697_v60 }
 0x535   :  { %v701_v62 = vmul.f32 %v699_v61, %v699_v61 }
 0x537   :  { %v703_v63 = vsel %vm44_vm0, %v701_v62, 0.0 }
 0x538   :  { %704 = vadd.xlane.f32.xlu2 %v703_v63 }
 0x539   :  { %v696_v0 = vpop.xlane.xlu0 %695 }
 0x53a   :  { %v698_v48 = vmul.f32 %v696_v0, %v1918_v10 }
 0x53c   :  { %v700_v1 = vsub.f32 %v690_v55, %v698_v48 }
 0x53e   :  { %v702_v2 = vmul.f32 %v700_v1, %v700_v1 }
 0x540   :  { %v706_v59 = vsel %vm44_vm0, %v702_v2, 0.0 }
 0x541   :  { %707 = vadd.xlane.f32.xlu1 %v706_v59 }
 0x5ab   :  { %v705_v6 = vpop.xlane.xlu2 %704 }
 0x5ac   :  { %v709_v7 = vmul.f32 %v705_v6, %v1918_v10 }
 0x5ae   :  { %v711_v8 = vadd.f32 1e-12, %v709_v7  ;;  %v1642_v7 = vld [vmem:[%s2335_s1 + $0x38] sm:$0xff] }
 0x5af   :  { %894 = vmatpush.msrb.mxu2 %v1642_v7 }
 0x5b0   :  { %1787 = vrsqrt.f32 %v711_v8  ;;  %vm719_vm10 = vweird.f32 %v711_v8 }
 0x5b4   :  { %v708_v13 = vpop.xlane.xlu1 %707 }
 0x5b5   :  { %v710_v14 = vmul.f32 %v708_v13, %v1918_v10 }
 0x5b6   :  { %v1788_v16 = vpop.eup %1787 }
 0x5b7   :  { %v714_v17 = vmul.f32 %v1788_v16, %v711_v8  ;;  %v712_v18 = vadd.f32 1e-12, %v710_v14  ;;  %vm720_vm9 = vweird.f32 %v1788_v16  ;;  %v1641_v8 = vld [vmem:[%s2335_s1 + $0x30] sm:$0xff] }
 0x5b8   :  { %vm721_vm11 = vmor %vm719_vm10, %vm720_vm9  ;;  %895 = vmatpush.msrb.mxu2 %v1641_v8 }
 0x5b9   :  { %v715_v20 = vmul.f32 %v1788_v16, %v714_v17  ;;  %1789 = vrsqrt.f32 %v712_v18  ;;  %vm729_vm14 = vweird.f32 %v712_v18 }
 0x5ba   :  { %896 = vmatpush.msrb.mxu2 %v1640_v9 }
 0x5bb   :  { %v716_v21 = vmul.f32 0.5, %v715_v20 }
 0x5bc   :  { %897 = vmatpush.msrb.mxu2 %v1639_v11 }
 0x5bd   :  { %v717_v22 = vsub.f32 1.5, %v716_v21 }
 0x5bf   :  { %v1790_v23 = vpop.eup %1789  ;;  %v718_v24 = vmul.f32 %v1788_v16, %v717_v22  ;;  %v2148_v22 = vld [vmem:[%s2339_s5 + $0x8] sm:$0xff] }
 0x5c0   :  { %v724_v27 = vmul.f32 %v1790_v23, %v712_v18  ;;  %vm730_vm13 = vweird.f32 %v1790_v23  ;;  %v875_v44 = vperm.slane %v2148_v22, 7 }
 0x5c1   :  { %v722_v28 = vsel %vm721_vm11, %v1788_v16, %v718_v24  ;;  %vm731_vm15 = vmor %vm729_vm14, %vm730_vm13 }
 0x5c2   :  { %v733_v29 = vmul.f32 %v722_v28, %v699_v61  ;;  %v725_v31 = vmul.f32 %v1790_v23, %v724_v27  ;;  %v864_v27 = vperm.slane %v2148_v22, 0 }
 0x5c4   :  { %v736_v33 = vmul.f32 %v735_v25, %v733_v29  ;;  %v726_v34 = vmul.f32 0.5, %v725_v31 }
 0x5c6   :  { %v727_v35 = vsub.f32 1.5, %v726_v34  ;;  %v739_v37 = vadd.f32 %v738_v32, %v736_v33  ;;  %v867_v33 = vperm.slane %v2148_v22, 1 }
 0x5c8   :  { %v728_v38 = vmul.f32 %v1790_v23, %v727_v35  ;;  %1634 = vmatmul.msk.f32.vlgmr.msra.gmra.mxu1 %vm44_vm0, %v739_v37 }
 0x5ca   :  { %v732_v43 = vsel %vm731_vm15, %v1790_v23, %v728_v38 }
 0x5cb   :  { %v734_v39 = vmul.f32 %v732_v43, %v700_v1 }
 0x5cd   :  { %v737_v40 = vmul.f32 %v735_v25, %v734_v39 }
 0x5cf   :  { %v740_v41 = vadd.f32 %v738_v32, %v737_v40 }
 0x5d1   :  { %1635 = vmatmul.msk.f32.gmra.mxu1 %vm44_vm0, %v740_v41 }
 0x645   :  { %v769_v47 = vpop.f32.mrf.mxu1 }
 0x646   :  { %v770_v49 = vadd.f32 %v769_v47, %v745_v46 }
 0x648   :  { %v775_v50 = vmax.f32 %v770_v49, 0.0 }
 0x64a   :  { %1636 = vmatmul.msk.f32.vlgmr.msra.gmra.mxu3 %vm786_vm1, %v775_v50 }
 0x64e   :  { %v772_v51 = vpop.f32.mrf.mxu1 }
 0x64f   :  { %v773_v52 = vadd.f32 %v772_v51, %v745_v46 }
 0x651   :  { %v776_v57 = vmax.f32 %v773_v52, 0.0 }
 0x653   :  { %1637 = vmatmul.msk.f32.gmra.mxu3 %vm786_vm1, %v776_v57 }
 0x6cd   :  { %v810_v55 = vpop.f32.mrf.mxu3 }
 0x6ce   :  { %v811_v56 = vadd.f32 %v810_v55, %v785_v54 }
 0x6d0   :  { %v816_v58 = vadd.f32 %v811_v56, %v739_v37 }
 0x6d2   :  { %v820_v60 = vsel %vm44_vm0, %v816_v58, 0.0 }
 0x6d3   :  { %821 = vadd.xlane.f32.xlu0 %v820_v60 }
 0x6d6   :  { %v813_v61 = vpop.f32.mrf.mxu3 }
 0x6d7   :  { %v814_v62 = vadd.f32 %v813_v61, %v785_v54 }
 0x6d9   :  { %v817_v63 = vadd.f32 %v814_v62, %v740_v41 }
 0x6db   :  { %v823_v0 = vsel %vm44_vm0, %v817_v63, 0.0 }
 0x6dc   :  { %824 = vadd.xlane.f32.xlu2 %v823_v0 }
 0x746   :  { %v822_v48 = vpop.xlane.xlu0 %821 }
 0x747   :  { %v826_v1 = vmul.f32 %v822_v48, %v1918_v10 }
 0x749   :  { %v828_v2 = vsub.f32 %v816_v58, %v826_v1 }
 0x74b   :  { %v830_v59 = vmul.f32 %v828_v2, %v828_v2 }
 0x74d   :  { %v832_v53 = vsel %vm44_vm0, %v830_v59, 0.0 }
 0x74e   :  { %833 = vadd.xlane.f32.xlu1 %v832_v53 }
 0x74f   :  { %v825_v36 = vpop.xlane.xlu2 %824 }
 0x750   :  { %v827_v3 = vmul.f32 %v825_v36, %v1918_v10 }
 0x752   :  { %v829_v4 = vsub.f32 %v817_v63, %v827_v3 }
 0x754   :  { %v831_v5 = vmul.f32 %v829_v4, %v829_v4 }
 0x756   :  { %v835_v6 = vsel %vm44_vm0, %v831_v5, 0.0 }
 0x757   :  { %836 = vadd.xlane.f32.xlu0 %v835_v6 }
 0x7c1   :  { %v834_v12 = vpop.xlane.xlu1 %833 }
 0x7c2   :  { %v838_v13 = vmul.f32 %v834_v12, %v1918_v10 }
 0x7c4   :  { %v840_v14 = vadd.f32 1e-12, %v838_v13 }
 0x7c6   :  { %1791 = vrsqrt.f32 %v840_v14  ;;  %vm848_vm3 = vweird.f32 %v840_v14 }
 0x7ca   :  { %v837_v15 = vpop.xlane.xlu0 %836 }
 0x7cb   :  { %v839_v16 = vmul.f32 %v837_v15, %v1918_v10 }
 0x7cc   :  { %v1792_v17 = vpop.eup %1791 }
 0x7cd   :  { %v843_v18 = vmul.f32 %v1792_v17, %v840_v14  ;;  %v841_v19 = vadd.f32 1e-12, %v839_v16  ;;  %vm849_vm2 = vweird.f32 %v1792_v17 }
 0x7ce   :  { %vm850_vm4 = vmor %vm848_vm3, %vm849_vm2 }
 0x7cf   :  { %v844_v20 = vmul.f32 %v1792_v17, %v843_v18  ;;  %1793 = vrsqrt.f32 %v841_v19  ;;  %vm858_vm7 = vweird.f32 %v841_v19 }
 0x7d1   :  { %v845_v21 = vmul.f32 0.5, %v844_v20 }
 0x7d3   :  { %v846_v23 = vsub.f32 1.5, %v845_v21 }
 0x7d5   :  { %v1794_v24 = vpop.eup %1793  ;;  %v847_v25 = vmul.f32 %v1792_v17, %v846_v23 }
 0x7d6   :  { %v853_v28 = vmul.f32 %v1794_v24, %v841_v19  ;;  %vm859_vm6 = vweird.f32 %v1794_v24 }
 0x7d7   :  { %v851_v29 = vsel %vm850_vm4, %v1792_v17, %v847_v25  ;;  %vm860_vm9 = vmor %vm858_vm7, %vm859_vm6 }
 0x7d8   :  { %v862_v31 = vmul.f32 %v851_v29, %v828_v2  ;;  %v854_v32 = vmul.f32 %v1794_v24, %v853_v28 }
 0x7da   :  { %v865_v34 = vmul.f32 %v864_v27, %v862_v31  ;;  %v855_v35 = vmul.f32 0.5, %v854_v32 }
 0x7dc   :  { %v856_v37 = vsub.f32 1.5, %v855_v35  ;;  %v2152_v38 = vadd.f32 %v867_v33, %v865_v34 }
 0x7de   :  { %v857_v43 = vmul.f32 %v1794_v24, %v856_v37  ;;  %1643 = vmatmul.msk.f32.vlgmr.msrb.gmra.mxu2 %vm44_vm0, %v2152_v38 }
 0x7e0   :  { %v861_v39 = vsel %vm860_vm9, %v1794_v24, %v857_v43 }
 0x7e1   :  { %v863_v40 = vmul.f32 %v861_v39, %v829_v4 }
 0x7e3   :  { %v866_v41 = vmul.f32 %v864_v27, %v863_v40 }
 0x7e5   :  { %v2156_v42 = vadd.f32 %v867_v33, %v866_v41 }
 0x7e7   :  { %1644 = vmatmul.msk.f32.gmra.mxu2 %vm44_vm0, %v2156_v42 }
 0x861   :  { %v899_v45 = vpop.f32.mrf.mxu2 }
 0x862   :  { %v900_v46 = vadd.f32 %v899_v45, %v875_v44 }
 0x864   :  { %1025 = vrot.lane.b32.xlu0 %v900_v46, %s1864_s16  ;;  %1029 = vrot.lane.b32.xlu1 %v900_v46, %s1858_s10 }
 0x86a   :  { %v902_v47 = vpop.f32.mrf.mxu2 }
 0x86b   :  { %v903_v49 = vadd.f32 %v902_v47, %v875_v44 }
 0x86c   :  { %907 = vrot.lane.b32.xlu0 %v900_v46, %s1860_s12 }
 0x86d   :  { %1031 = vrot.lane.b32.xlu2 %v903_v49, %s1858_s10  ;;  %1027 = vrot.lane.b32.xlu1 %v903_v49, %s1864_s16  ;;  %v2174_v50 = vpack.i.bf16 %v900_v46, %v903_v49 }
 0x874   :  { %1273 = vrot.lane.b32.xlu0 %v900_v46, %s1862_s14 }
 0x875   :  { %909 = vrot.lane.b32.xlu2 %v903_v49, %s1860_s12  ;;  %1269 = vrot.lane.b32.xlu1 %v900_v46, %s1866_s18 }
 0x87c   :  { %1151 = vrot.lane.b32.xlu0 %v900_v46, %s1859_s11 }
 0x87d   :  { %1275 = vrot.lane.b32.xlu2 %v903_v49, %s1862_s14  ;;  %1271 = vrot.lane.b32.xlu1 %v903_v49, %s1866_s18 }
 0x884   :  { %1149 = vrot.lane.b32.xlu0 %v903_v49, %s1861_s13 }
 0x885   :  { %1153 = vrot.lane.b32.xlu2 %v903_v49, %s1859_s11 }
 0x88c   :  { %1735 = vrot.lane.b32.xlu0 %v2174_v50, %s1865_s17 }
 0x88d   :  { %1147 = vrot.lane.b32.xlu2 %v900_v46, %s1861_s13 }
 0x8c7   :  { %v1032_v51 = vpop.permute.xlu2 %1031 }
 0x8c8   :  { %1651 = vmatpush.xpose.msk.msrb.mxu3 %vm142_vm8, %v1032_v51 }
 0x8cf   :  { %v910_v52 = vpop.permute.xlu2 %909 }
 0x8d0   :  { %1645 = vmatpush.xpose.msk.msrb.mxu0 %vm142_vm8, %v910_v52 }
 0x8d6   :  { %v1026_v57 = vpop.permute.xlu0 %1025  ;;  %v1030_v54 = vpop.permute.xlu1 %1029 }
 0x8d7   :  { %v1276_v55 = vpop.permute.xlu2 %1275  ;;  %1652 = vmatpush.xpose.msk.msrb.mxu3 %vm142_vm8, %v1030_v54 }
 0x8da   :  { %1653 = vmatmul.msk.f32.vlgmr.msrb.gmra.mxu3 %vm142_vm8, %v1026_v57 }
 0x8db   :  { %1663 = vmatpush.xpose.msk.msra.mxu3 %vm142_vm8, %v1276_v55 }
 0x8de   :  { %v908_v56 = vpop.permute.xlu0 %907 }
 0x8df   :  { %v1154_v58 = vpop.permute.xlu2 %1153  ;;  %1646 = vmatpush.xpose.msk.msrb.mxu0 %vm142_vm8, %v908_v56  ;;  %v1028_v60 = vpop.permute.xlu1 %1027 }
 0x8e2   :  { %1647 = vmatmul.msk.f32.vlgmr.msrb.gmra.mxu0 %vm142_vm8, %v900_v46  ;;  %1654 = vmatmul.msk.f32.gmra.mxu3 %vm142_vm8, %v1028_v60 }
 0x8e3   :  { %1657 = vmatpush.xpose.msk.msra.mxu0 %vm142_vm8, %v1154_v58 }
 0x8e6   :  { %v1274_v61 = vpop.permute.xlu0 %1273 }
 0x8e7   :  { %1664 = vmatpush.xpose.msk.msra.mxu3 %vm142_vm8, %v1274_v61  ;;  %v1270_v62 = vpop.permute.xlu1 %1269  ;;  %v1148_v0 = vpop.permute.xlu2 %1147 }
 0x8ea   :  { %1648 = vmatmul.msk.f32.gmra.mxu0 %vm142_vm8, %v903_v49  ;;  %1665 = vmatmul.msk.f32.vlgmr.msra.gmra.mxu3 %vm142_vm8, %v1270_v62 }
 0x8ee   :  { %v1152_v63 = vpop.permute.xlu0 %1151 }
 0x8ef   :  { %1658 = vmatpush.xpose.msk.msra.mxu0 %vm142_vm8, %v1152_v63  ;;  %v1272_v48 = vpop.permute.xlu1 %1271 }
 0x8f2   :  { %1659 = vmatmul.msk.f32.vlgmr.msra.gmra.mxu0 %vm142_vm8, %v1148_v0  ;;  %1666 = vmatmul.msk.f32.gmra.mxu3 %vm142_vm8, %v1272_v48 }
 0x8f6   :  { %v1150_v1 = vpop.permute.xlu0 %1149 }
 0x8fa   :  { %1660 = vmatmul.msk.f32.gmra.mxu0 %vm142_vm8, %v1150_v1 }
 0x8fe   :  { %v1736_v2 = vpop.permute.xlu0 %1735 }
 0x8ff   :  { %v1737_v59 = vunpack.i.l.bf16 %v1736_v2  ;;  %v1738_v53 = vunpack.i.h.bf16 %v1736_v2 }
 0x901   :  { %986 = vmatpush.msrb.mxu1 %v1737_v59 }
 0x903   :  { %987 = vmatpush.msrb.mxu1 %v1738_v53 }
 0x95d   :  { %v1058_v36 = vpop.f32.mrf.mxu3 }
 0x95e   :  { %v1059_v3 = vadd.f32 %v1058_v36, %v1990_v26 }
 0x95f   :  { %v936_v4 = vpop.f32.mrf.mxu0 }
 0x960   :  { %v937_v5 = vadd.f32 %v936_v4, %v1990_v26  ;;  %v1064_v6 = vsel %vm174_vm12, %v1059_v3, -inf }
 0x961   :  { %1065 = vmax.xlane.f32.xlu1 %v1064_v6 }
 0x962   :  { %v942_v7 = vsel %vm174_vm12, %v937_v5, -inf }
 0x963   :  { %943 = vmax.xlane.f32.xlu2 %v942_v7 }
 0x965   :  { %v1061_v8 = vpop.f32.mrf.mxu3 }
 0x966   :  { %v1062_v9 = vadd.f32 %v1061_v8, %v1994_v30 }
 0x967   :  { %v939_v11 = vpop.f32.mrf.mxu0 }
 0x968   :  { %v940_v12 = vadd.f32 %v939_v11, %v1994_v30  ;;  %v1067_v13 = vsel %vm174_vm12, %v1062_v9, -inf }
 0x969   :  { %1068 = vmax.xlane.f32.xlu0 %v1067_v13 }
 0x96a   :  { %v945_v14 = vsel %vm174_vm12, %v940_v12, -inf }
 0x96b   :  { %946 = vmax.xlane.f32.xlu1 %v945_v14 }
 0x96d   :  { %v1302_v15 = vpop.f32.mrf.mxu3 }
 0x96e   :  { %v1303_v16 = vadd.f32 %v1302_v15, %v1990_v26 }
 0x96f   :  { %v1180_v17 = vpop.f32.mrf.mxu0 }
 0x970   :  { %v1308_v18 = vsel %vm174_vm12, %v1303_v16, -inf  ;;  %v1181_v19 = vadd.f32 %v1180_v17, %v1990_v26 }
 0x972   :  { %v1186_v20 = vsel %vm174_vm12, %v1181_v19, -inf }
 0x973   :  { %1309 = vmax.xlane.f32.xlu1 %v1308_v18 }
 0x975   :  { %v1305_v26 = vpop.f32.mrf.mxu3 }
 0x976   :  { %v2219_v25 = vadd.f32 %v1305_v26, %v1994_v30 }
 0x977   :  { %v1183_v21 = vpop.f32.mrf.mxu0 }
 0x978   :  { %v2212_v23 = vadd.f32 %v1183_v21, %v1994_v30  ;;  %v1311_v27 = vsel %vm174_vm12, %v2219_v25, -inf }
 0x97a   :  { %v1189_v24 = vsel %vm174_vm12, %v2212_v23, -inf }
 0x97b   :  { %1730 = vrot.lane.b32.xlu2 %v2174_v50, %s1863_s15  ;;  %1187 = vmax.xlane.f32.xlu1 %v1186_v20  ;;  %s1594_s15 = sshll.u32 %s2340_s6, 4  ;;  %s1595_s15 = int_to_ptr.hbm [resolvable:$true] %s1594_s15 }
 0x97d   :  { %1740 = vrot.lane.b32.xlu0 %v2174_v50, %s1869_s20 }
 0x983   :  { %1190 = vmax.xlane.f32.xlu1 %v1189_v24 }
 0x985   :  { %1745 = vrot.lane.b32.xlu0 %v2174_v50, %s1868_s19 }
 0x9a4   :  { %1312 = vmax.xlane.f32.xlu2 %v1311_v27 }
 0x9d4   :  { %v1066_v28 = vpop.xlane.xlu1 %1065 }
 0x9d5   :  { %v1070_v29 = vsub.f32 %v1059_v3, %v1066_v28 }
 0x9d6   :  { %v944_v31 = vpop.xlane.xlu2 %943 }
 0x9d7   :  { %v1072_v32 = vmul.f32 1.442695, %v1070_v29  ;;  %v948_v33 = vsub.f32 %v937_v5, %v944_v31 }
 0x9d9   :  { %1795 = vpow2.f32 %v1072_v32  ;;  %v950_v34 = vmul.f32 1.442695, %v948_v33 }
 0x9db   :  { %1797 = vpow2.f32 %v950_v34 }
 0x9dc   :  { %v1069_v35 = vpop.xlane.xlu0 %1068 }
 0x9dd   :  { %v1071_v37 = vsub.f32 %v1062_v9, %v1069_v35 }
 0x9de   :  { %v1731_v43 = vpop.permute.xlu2 %1730  ;;  %v947_v39 = vpop.xlane.xlu1 %946 }
 0x9df   :  { %v1796_v40 = vpop.eup %1795  ;;  %v1074_v41 = vmul.f32 1.442695, %v1071_v37  ;;  %v1732_v30 = vunpack.i.l.bf16 %v1731_v43  ;;  %v949_v44 = vsub.f32 %v940_v12, %v947_v39  ;;  %v1733_v47 = vunpack.i.h.bf16 %v1731_v43 }
 0x9e0   :  { %v1076_v45 = vsel %vm174_vm12, %v1796_v40, 0.0 }
 0x9e1   :  { %v1798_v46 = vpop.eup %1797  ;;  %1799 = vpow2.f32 %v1074_v41  ;;  %v952_v49 = vmul.f32 1.442695, %v949_v44  ;;  %1108 = vmatpush.msra.mxu2 %v1732_v30  ;;  %1077 = vadd.xlane.f32.xlu1 %v1076_v45 }
 0x9e2   :  { %1649 = vmatmul.msk.f32.vlgmr.msrb.gmra.mxu1 %vm174_vm12, %v1798_v46  ;;  %v954_v50 = vsel %vm174_vm12, %v1798_v46, 0.0 }
 0x9e3   :  { %1801 = vpow2.f32 %v952_v49  ;;  %1109 = vmatpush.msra.mxu2 %v1733_v47  ;;  %955 = vadd.xlane.f32.xlu2 %v954_v50 }
 0x9e4   :  { %1655 = vmatmul.msk.f32.vlgmr.msra.gmra.mxu2 %vm174_vm12, %v1796_v40 }
 0x9e6   :  { %v1310_v51 = vpop.xlane.xlu1 %1309 }
 0x9e7   :  { %v1800_v52 = vpop.eup %1799  ;;  %v1314_v57 = vsub.f32 %v1303_v16, %v1310_v51 }
 0x9e8   :  { %v1079_v54 = vsel %vm174_vm12, %v1800_v52, 0.0 }
 0x9e9   :  { %v1802_v55 = vpop.eup %1801  ;;  %v1316_v56 = vmul.f32 1.442695, %v1314_v57  ;;  %1080 = vadd.xlane.f32.xlu1 %v1079_v54 }
 0x9ea   :  { %1650 = vmatmul.msk.f32.gmra.mxu1 %vm174_vm12, %v1802_v55  ;;  %v957_v15 = vsel %vm174_vm12, %v1802_v55, 0.0 }
 0x9eb   :  { %1803 = vpow2.f32 %v1316_v56 }
 0x9ec   :  { %1656 = vmatmul.msk.f32.gmra.mxu2 %vm174_vm12, %v1800_v52 }
 0x9ee   :  { %v1188_v58 = vpop.xlane.xlu1 %1187 }
 0x9ef   :  { %v1192_v60 = vsub.f32 %v1181_v19, %v1188_v58  ;;  %v1741_v61 = vpop.permute.xlu0 %1740 }
 0x9f0   :  { %v1742_v62 = vunpack.i.l.bf16 %v1741_v61  ;;  %v1743_v48 = vunpack.i.h.bf16 %v1741_v61 }
 0x9f1   :  { %v1804_v63 = vpop.eup %1803  ;;  %v1194_v0 = vmul.f32 1.442695, %v1192_v60 }
 0x9f2   :  { %1352 = vmatpush.msrb.mxu2 %v1742_v62  ;;  %v1320_v1 = vsel %vm174_vm12, %v1804_v63, 0.0 }
 0x9f3   :  { %1805 = vpow2.f32 %v1194_v0  ;;  %1321 = vadd.xlane.f32.xlu1 %v1320_v1 }
 0x9f4   :  { %1353 = vmatpush.msrb.mxu2 %v1743_v48 }
 0x9f5   :  { %1667 = vmatmul.msk.f32.vlgmr.msrb.gmra.mxu2 %vm174_vm12, %v1804_v63 }
 0x9f6   :  { %v1191_v2 = vpop.xlane.xlu1 %1190 }
 0x9f7   :  { %v1193_v59 = vsub.f32 %v2212_v23, %v1191_v2  ;;  %v1746_v53 = vpop.permute.xlu0 %1745 }
 0x9f8   :  { %v1747_v36 = vunpack.i.l.bf16 %v1746_v53  ;;  %v1748_v5 = vunpack.i.h.bf16 %v1746_v53 }
 0x9f9   :  { %v1806_v3 = vpop.eup %1805  ;;  %v1196_v4 = vmul.f32 1.442695, %v1193_v59 }
 0x9fa   :  { %1230 = vmatpush.msra.mxu1 %v1747_v36  ;;  %v1198_v6 = vsel %vm174_vm12, %v1806_v3, 0.0 }
 0x9fb   :  { %1807 = vpow2.f32 %v1196_v4  ;;  %1199 = vadd.xlane.f32.xlu0 %v1198_v6 }
 0x9fc   :  { %1231 = vmatpush.msra.mxu1 %v1748_v5 }
 0x9fd   :  { %1661 = vmatmul.msk.f32.vlgmr.msra.gmra.mxu1 %vm174_vm12, %v1806_v3 }
 0xa01   :  { %v1808_v7 = vpop.eup %1807 }
 0xa02   :  { %v1201_v8 = vsel %vm174_vm12, %v1808_v7, 0.0 }
 0xa03   :  { %1202 = vadd.xlane.f32.xlu1 %v1201_v8 }
 0xa05   :  { %1662 = vmatmul.msk.f32.gmra.mxu1 %vm174_vm12, %v1808_v7 }
 0xa17   :  { %v1313_v9 = vpop.xlane.xlu2 %1312 }
 0xa18   :  { %v1315_v11 = vsub.f32 %v2219_v25, %v1313_v9 }
 0xa1a   :  { %v1318_v12 = vmul.f32 1.442695, %v1315_v11 }
 0xa1c   :  { %1809 = vpow2.f32 %v1318_v12 }
 0xa22   :  { %v1810_v13 = vpop.eup %1809 }
 0xa23   :  { %1668 = vmatmul.msk.f32.gmra.mxu2 %vm174_vm12, %v1810_v13  ;;  %v1323_v14 = vsel %vm174_vm12, %v1810_v13, 0.0 }
 0xa24   :  { %1324 = vadd.xlane.f32.xlu1 %v1323_v14 }
 0xa2c   :  { %958 = vadd.xlane.f32.xlu1 %v957_v15 }
 0xa54   :  { %v1078_v16 = vpop.xlane.xlu1 %1077 }
 0xa55   :  { %1811 = vrcp.f32 %v1078_v16  ;;  %v1128_v23 = vand.u32 2147483648, %v1078_v16  ;;  %vm1122_vm11 = vweird.f32 %v1078_v16  ;;  %v1126_v26 = vand.u32 2147483647, %v1078_v16 }
 0xa57   :  { %v1129_v29 = vor.u32 1.1754944e-38, %v1128_v23  ;;  %vm1127_vm14 = vcmp.eq.f32.partialorder %v1126_v26, 8.507059e+37 }
 0xa5b   :  { %v1812_v17 = vpop.eup %1811 }
 0xa5c   :  { %v1118_v18 = vmul.f32 %v1812_v17, %v1078_v16  ;;  %v1081_v19 = vpop.xlane.xlu1 %1080  ;;  %vm1123_vm10 = vweird.f32 %v1812_v17 }
 0xa5d   :  { %1813 = vrcp.f32 %v1081_v19  ;;  %vm1124_vm13 = vmor %vm1122_vm11, %vm1123_vm10  ;;  %v1143_v43 = vand.u32 2147483648, %v1081_v19  ;;  %vm1137_vm2 = vweird.f32 %v1081_v19  ;;  %v1141_v40 = vand.u32 2147483647, %v1081_v19 }
 0xa5e   :  { %v1119_v20 = vsub.f32 1.0, %v1118_v18 }
 0xa5f   :  { %v2242_v41 = vpop.f32.mrf.mxu1  ;;  %v1144_v45 = vor.u32 1.1754944e-38, %v1143_v43  ;;  %vm1142_vm4 = vcmp.eq.f32.partialorder %v1141_v40, 8.507059e+37  ;;  %v1671_v40 = vld [vmem:[%s2336_s2 + $0x30] sm:$0xff] }
 0xa60   :  { %v1120_v21 = vmul.f32 %v1812_v17, %v1119_v20 }
 0xa62   :  { %v1121_v24 = vadd.f32 %v1812_v17, %v1120_v21 }
 0xa63   :  { %v1814_v25 = vpop.eup %1813 }
 0xa64   :  { %v1133_v27 = vmul.f32 %v1814_v25, %v1081_v19  ;;  %v1125_v28 = vsel %vm1124_vm13, %v1812_v17, %v1121_v24  ;;  %vm1138_vm15 = vweird.f32 %v1814_v25 }
 0xa65   :  { %v1130_v34 = vsel %vm1127_vm14, %v1129_v29, %v1125_v28  ;;  %vm1139_vm3 = vmor %vm1137_vm2, %vm1138_vm15 }
 0xa66   :  { %v1134_v31 = vsub.f32 1.0, %v1133_v27  ;;  %v1322_v32 = vpop.xlane.xlu1 %1321 }
 0xa67   :  { %1815 = vrcp.f32 %v1322_v32  ;;  %v1111_v33 = vpop.f32.mrf.mxu2  ;;  %v1372_v57 = vand.u32 2147483648, %v1322_v32  ;;  %v1370_v55 = vand.u32 2147483647, %v1322_v32  ;;  %vm1366_vm7 = vweird.f32 %v1322_v32  ;;  %v2245_v60 = vpop.f32.mrf.mxu1 }
 0xa68   :  { %v1131_v35 = vmul.f32 %v1130_v34, %v1111_v33  ;;  %v1135_v37 = vmul.f32 %v1814_v25, %v1134_v31 }
 0xa69   :  { %v1373_v61 = vor.u32 1.1754944e-38, %v1372_v57  ;;  %vm1371_vm10 = vcmp.eq.f32.partialorder %v1370_v55, 8.507059e+37 }
 0xa6a   :  { %1393 = vrot.lane.b32.xlu2 %v1131_v35, %s1871_s22  ;;  %v1136_v39 = vadd.f32 %v1814_v25, %v1135_v37 }
 0xa6c   :  { %v1140_v30 = vsel %vm1139_vm3, %v1814_v25, %v1136_v39  ;;  %v1672_v39 = vld [vmem:[%s2336_s2 + $0x38] sm:$0xff] }
 0xa6d   :  { %v1816_v44 = vpop.eup %1815  ;;  %v1145_v50 = vsel %vm1142_vm4, %v1144_v45, %v1140_v30  ;;  %1445 = vmatpush.msrb.mxu0 %v1672_v39  ;;  %v1670_v30 = vld [vmem:[%s2336_s2 + $0x28] sm:$0xff]  ;;  %v1669_v45 = vld [vmem:[%s2336_s2 + $0x20] sm:$0xff]  ;;  %s1874_s2 = smov 128  }
 0xa6e   :  { %v1362_v46 = vmul.f32 %v1816_v44, %v1322_v32  ;;  %v1200_v47 = vpop.xlane.xlu0 %1199  ;;  %vm1367_vm6 = vweird.f32 %v1816_v44  ;;  %v1675_v39 = vld [vmem:[%s2337_s3 + $0x20] sm:$0xff] }
 0xa6f   :  { %1817 = vrcp.f32 %v1200_v47  ;;  %v1114_v49 = vpop.f32.mrf.mxu2  ;;  %vm1368_vm9 = vmor %vm1366_vm7, %vm1367_vm6  ;;  %v1250_v53 = vand.u32 2147483648, %v1200_v47  ;;  %v1248_v3 = vand.u32 2147483647, %v1200_v47  ;;  %vm1244_vm13 = vweird.f32 %v1200_v47  ;;  %1446 = vmatpush.msrb.mxu0 %v1671_v40 }
 0xa70   :  { %v1363_v51 = vsub.f32 1.0, %v1362_v46  ;;  %v1146_v52 = vmul.f32 %v1145_v50, %v1114_v49 }
 0xa71   :  { %v1251_v7 = vor.u32 1.1754944e-38, %v1250_v53  ;;  %vm1249_vm15 = vcmp.eq.f32.partialorder %v1248_v3, 8.507059e+37  ;;  %1447 = vmatpush.msrb.mxu0 %v1670_v30 }
 0xa72   :  { %1395 = vrot.lane.b32.xlu2 %v1146_v52, %s1871_s22  ;;  %v1364_v54 = vmul.f32 %v1816_v44, %v1363_v51 }
 0xa73   :  { %1448 = vmatpush.msrb.mxu0 %v1669_v45 }
 0xa74   :  { %v1365_v56 = vadd.f32 %v1816_v44, %v1364_v54 }
 0xa75   :  { %v1818_v58 = vpop.eup %1817 }
 0xa76   :  { %v1240_v62 = vmul.f32 %v1818_v58, %v1200_v47  ;;  %v1203_v63 = vpop.xlane.xlu1 %1202  ;;  %v1369_v0 = vsel %vm1368_vm9, %v1816_v44, %v1365_v56  ;;  %vm1245_vm11 = vweird.f32 %v1818_v58  ;;  %v956_v44 = vpop.xlane.xlu2 %955 }
 0xa77   :  { %1819 = vrcp.f32 %v1203_v63  ;;  %v1374_v48 = vsel %vm1371_vm10, %v1373_v61, %v1369_v0  ;;  %vm1246_vm14 = vmor %vm1244_vm13, %vm1245_vm11  ;;  %v1265_v14 = vand.u32 2147483648, %v1203_v63  ;;  %v1263_v16 = vand.u32 2147483647, %v1203_v63 }
 0xa78   :  { %v1241_v1 = vsub.f32 1.0, %v1240_v62  ;;  %v1355_v2 = vpop.f32.mrf.mxu2  ;;  %vm1259_vm3 = vweird.f32 %v1203_v63  ;;  %v1006_v54 = vand.u32 2147483648, %v956_v44  ;;  %v1004_v55 = vand.u32 2147483647, %v956_v44 }
 0xa79   :  { %v1375_v59 = vmul.f32 %v1374_v48, %v1355_v2  ;;  %v1266_v18 = vor.u32 1.1754944e-38, %v1265_v14  ;;  %vm1264_vm6 = vcmp.eq.f32.partialorder %v1263_v16, 8.507059e+37 }
 0xa7a   :  { %v1242_v36 = vmul.f32 %v1818_v58, %v1241_v1  ;;  %v1233_v6 = vpop.f32.mrf.mxu1  ;;  %v1007_v61 = vor.u32 1.1754944e-38, %v1006_v54 }
 0xa7b   :  { %1409 = vrot.lane.b32.xlu0 %v1375_v59, %s1872_s23 }
 0xa7c   :  { %v1243_v4 = vadd.f32 %v1818_v58, %v1242_v36 }
 0xa7d   :  { %v1820_v5 = vpop.eup %1819 }
 0xa7e   :  { %v1255_v8 = vmul.f32 %v1820_v5, %v1203_v63  ;;  %v1247_v9 = vsel %vm1246_vm14, %v1818_v58, %v1243_v4  ;;  %vm1260_vm2 = vweird.f32 %v1820_v5  ;;  %vm1000_vm14 = vweird.f32 %v956_v44 }
 0xa7f   :  { %v1252_v11 = vsel %vm1249_vm15, %v1251_v7, %v1247_v9  ;;  %vm1261_vm4 = vmor %vm1259_vm3, %vm1260_vm2  ;;  %vm1005_vm2 = vcmp.eq.f32.partialorder %v1004_v55, 8.507059e+37  ;;  %v1685_v55 = vld [vmem:[%s2338_s4 + $0x60] sm:$0xff] }
 0xa80   :  { %v1256_v12 = vsub.f32 1.0, %v1255_v8  ;;  %v1253_v13 = vmul.f32 %v1252_v11, %v1233_v6 }
 0xa82   :  { %v1257_v15 = vmul.f32 %v1820_v5, %v1256_v12  ;;  %1401 = vrot.lane.b32.xlu1 %v1253_v13, %s1870_s21  ;;  %v1236_v20 = vpop.f32.mrf.mxu1 }
 0xa84   :  { %v1258_v17 = vadd.f32 %v1820_v5, %v1257_v15 }
 0xa86   :  { %v1262_v19 = vsel %vm1261_vm4, %v1820_v5, %v1258_v17  ;;  %v1426_v17 = vperm.slane %v2148_v22, 4 }
 0xa87   :  { %v1267_v21 = vsel %vm1264_vm6, %v1266_v18, %v1262_v19 }
 0xa88   :  { %v1268_v23 = vmul.f32 %v1267_v21, %v1236_v20 }
 0xa8a   :  { %1403 = vrot.lane.b32.xlu0 %v1268_v23, %s1870_s21 }
 0xa97   :  { %v1325_v24 = vpop.xlane.xlu1 %1324 }
 0xa98   :  { %1821 = vrcp.f32 %v1325_v24  ;;  %v1387_v28 = vand.u32 2147483648, %v1325_v24  ;;  %v1385_v31 = vand.u32 2147483647, %v1325_v24  ;;  %vm1381_vm9 = vweird.f32 %v1325_v24 }
 0xa99   :  { %1823 = vrcp.f32 %v956_v44 }
 0xa9a   :  { %v1388_v33 = vor.u32 1.1754944e-38, %v1387_v28  ;;  %vm1386_vm11 = vcmp.eq.f32.partialorder %v1385_v31, 8.507059e+37 }
 0xa9e   :  { %v1822_v26 = vpop.eup %1821 }
 0xa9f   :  { %v1377_v25 = vmul.f32 %v1822_v26, %v1325_v24  ;;  %vm1382_vm7 = vweird.f32 %v1822_v26  ;;  %v1824_v46 = vpop.eup %1823  ;;  %v959_v50 = vpop.xlane.xlu1 %958 }
 0xaa0   :  { %vm1383_vm10 = vmor %vm1381_vm9, %vm1382_vm7  ;;  %v996_v47 = vmul.f32 %v1824_v46, %v956_v44  ;;  %1825 = vrcp.f32 %v959_v50  ;;  %vm1001_vm13 = vweird.f32 %v1824_v46  ;;  %v1021_v5 = vand.u32 2147483648, %v959_v50 }
 0xaa1   :  { %v1378_v27 = vsub.f32 1.0, %v1377_v25  ;;  %vm1002_vm15 = vmor %vm1000_vm14, %vm1001_vm13  ;;  %vm1015_vm4 = vweird.f32 %v959_v50  ;;  %v1019_v6 = vand.u32 2147483647, %v959_v50 }
 0xaa2   :  { %v997_v49 = vsub.f32 1.0, %v996_v47  ;;  %v1022_v8 = vor.u32 1.1754944e-38, %v1021_v5  ;;  %v1688_v47 = vld [vmem:[%s2338_s4 + $0x78] sm:$0xff] }
 0xaa3   :  { %v1379_v29 = vmul.f32 %v1822_v26, %v1378_v27  ;;  %vm1020_vm7 = vcmp.eq.f32.partialorder %v1019_v6, 8.507059e+37  ;;  %1569 = vmatpush.msrb.mxu3 %v1688_v47 }
 0xaa4   :  { %v998_v51 = vmul.f32 %v1824_v46, %v997_v49  ;;  %v1687_v49 = vld [vmem:[%s2338_s4 + $0x70] sm:$0xff] }
 0xaa5   :  { %v1380_v32 = vadd.f32 %v1822_v26, %v1379_v29  ;;  %1570 = vmatpush.msrb.mxu3 %v1687_v49 }
 0xaa6   :  { %v1358_v35 = vpop.f32.mrf.mxu2  ;;  %v999_v52 = vadd.f32 %v1824_v46, %v998_v51  ;;  %v1826_v57 = vpop.eup %1825  ;;  %v1686_v51 = vld [vmem:[%s2338_s4 + $0x68] sm:$0xff] }
 0xaa7   :  { %v1384_v34 = vsel %vm1383_vm10, %v1822_v26, %v1380_v32  ;;  %v1011_v58 = vmul.f32 %v1826_v57, %v959_v50  ;;  %vm1016_vm3 = vweird.f32 %v1826_v57  ;;  %1571 = vmatpush.msrb.mxu3 %v1686_v51 }
 0xaa8   :  { %v1389_v37 = vsel %vm1386_vm11, %v1388_v33, %v1384_v34  ;;  %v1003_v56 = vsel %vm1002_vm15, %v1824_v46, %v999_v52  ;;  %vm1017_vm6 = vmor %vm1015_vm4, %vm1016_vm3 }
 0xaa9   :  { %v1390_v43 = vmul.f32 %v1389_v37, %v1358_v35  ;;  %v1008_v62 = vsel %vm1005_vm2, %v1007_v61, %v1003_v56  ;;  %v1012_v63 = vsub.f32 1.0, %v1011_v58  ;;  %v1677_v37 = vld [vmem:[%s2337_s3 + $0x30] sm:$0xff]  ;;  %v1684_v61 = vld [vmem:[%s2338_s4 + $0x58] sm:$0xff]  ;;  %1572 = vmatpush.msrb.mxu3 %v1685_v55 }
 0xaaa   :  { %v1009_v48 = vmul.f32 %v1008_v62, %v2242_v41 }
 0xaab   :  { %1411 = vrot.lane.b32.xlu2 %v1390_v43, %s1872_s23  ;;  %v1013_v1 = vmul.f32 %v1826_v57, %v1012_v63  ;;  %v1676_v43 = vld [vmem:[%s2337_s3 + $0x28] sm:$0xff]  ;;  %v1502_v63 = vperm.slane %v2148_v22, 2  ;;  %1573 = vmatpush.msrb.mxu3 %v1684_v61 }
 0xaad   :  { %v1014_v4 = vadd.f32 %v1826_v57, %v1013_v1 }
 0xaaf   :  { %v1018_v7 = vsel %vm1017_vm6, %v1826_v57, %v1014_v4 }
 0xab0   :  { %v1023_v9 = vsel %vm1020_vm7, %v1022_v8, %v1018_v7 }
 0xab1   :  { %v1024_v11 = vmul.f32 %v1023_v9, %v2245_v60  ;;  %v1683_v9 = vld [vmem:[%s2338_s4 + $0x50] sm:$0xff] }
 0xab2   :  { %1574 = vmatpush.msrb.mxu3 %v1683_v9 }
 0xac4   :  { %v1394_v0 = vpop.permute.xlu2 %1393 }
 0xac5   :  { %v1415_v2 = vsel %vm142_vm8, %v1009_v48, %v1394_v0  ;;  %v1505_v48 = vperm.slane %v2148_v22, 3 }
 0xacc   :  { %v1396_v41 = vpop.permute.xlu2 %1395 }
 0xacd   :  { %v1416_v13 = vsel %vm142_vm8, %v1024_v11, %v1396_v41  ;;  %v1682_v11 = vld [vmem:[%s2338_s4 + $0x48] sm:$0xff] }
 0xace   :  { %1575 = vmatpush.msrb.mxu3 %v1682_v11 }
 0xaed   :  { %v1410_v53 = vpop.permute.xlu0 %1409 }
 0xaf4   :  { %v1402_v59 = vpop.permute.xlu1 %1401 }
 0xaf5   :  { %v1417_v36 = vsel %vm174_vm12, %v1415_v2, %v1402_v59 }
 0xaf6   :  { %v1419_v3 = vsel %vm652_vm5, %v1417_v36, %v1410_v53 }
 0xaf7   :  { %1673 = vmatmul.msk.f32.vlgmr.msrb.gmra.mxu0 %vm44_vm0, %v1419_v3 }
 0xafc   :  { %v1404_v12 = vpop.permute.xlu0 %1403 }
 0xafd   :  { %v1418_v14 = vsel %vm174_vm12, %v1416_v13, %v1404_v12  ;;  %v1681_v12 = vld [vmem:[%s2338_s4 + $0x40] sm:$0xff]  ;;  %v1513_v13 = vperm.slane %v2148_v22, 6  ;;  %s1873_s4 = smov [#allocation2]  }
 0xafe   :  { %1576 = vmatpush.msrb.mxu3 %v1681_v12  ;;  %s1592_s12 = sshll.u32 %s1873_s4, 4  ;;  %s1593_s12 = int_to_ptr.vmem [resolvable:$true] %s1592_s12 }
 0xb05   :  { %v1412_v15 = vpop.permute.xlu2 %1411 }
 0xb06   :  { %v1420_v16 = vsel %vm652_vm5, %v1418_v14, %v1412_v15 }
 0xb07   :  { %1674 = vmatmul.msk.f32.gmra.mxu0 %vm44_vm0, %v1420_v16 }
 0xb74   :  { %v1450_v18 = vpop.f32.mrf.mxu0 }
 0xb75   :  { %v1451_v19 = vadd.f32 %v1450_v18, %v1426_v17 }
 0xb77   :  { %v1456_v20 = vadd.f32 %v1451_v19, %v2152_v38 }
 0xb79   :  { %v1458_v21 = vsel %vm44_vm0, %v1456_v20, 0.0 }
 0xb7a   :  { %1459 = vadd.xlane.f32.xlu1 %v1458_v21 }
 0xb84   :  { %v1453_v60 = vpop.f32.mrf.mxu0 }
 0xb85   :  { %v1454_v23 = vadd.f32 %v1453_v60, %v1426_v17 }
 0xb87   :  { %v1457_v24 = vadd.f32 %v1454_v23, %v2156_v42  ;;  %v1678_v42 = vld [vmem:[%s2337_s3 + $0x38] sm:$0xff] }
 0xb88   :  { %1532 = vmatpush.msrb.mxu1 %v1678_v42 }
 0xb89   :  { %v1461_v26 = vsel %vm44_vm0, %v1457_v24, 0.0 }
 0xb8a   :  { %1462 = vadd.xlane.f32.xlu0 %v1461_v26  ;;  %1533 = vmatpush.msrb.mxu1 %v1677_v37 }
 0xb8c   :  { %1534 = vmatpush.msrb.mxu1 %v1676_v43 }
 0xb8e   :  { %1535 = vmatpush.msrb.mxu1 %v1675_v39 }
 0xbed   :  { %v1460_v25 = vpop.xlane.xlu1 %1459 }
 0xbee   :  { %v1464_v27 = vmul.f32 %v1460_v25, %v1918_v10 }
 0xbf0   :  { %v1466_v28 = vsub.f32 %v1456_v20, %v1464_v27  ;;  %v1554_v20 = vperm.slane %v2148_v22, 5 }
 0xbf2   :  { %v1468_v29 = vmul.f32 %v1466_v28, %v1466_v28 }
 0xbf4   :  { %v1470_v31 = vsel %vm44_vm0, %v1468_v29, 0.0 }
 0xbf5   :  { %1471 = vadd.xlane.f32.xlu2 %v1470_v31 }
 0xbfd   :  { %v1463_v32 = vpop.xlane.xlu0 %1462 }
 0xbfe   :  { %v1465_v38 = vmul.f32 %v1463_v32, %v1918_v10 }
 0xc00   :  { %v1467_v33 = vsub.f32 %v1457_v24, %v1465_v38 }
 0xc02   :  { %v1469_v34 = vmul.f32 %v1467_v33, %v1467_v33 }
 0xc04   :  { %v1473_v35 = vsel %vm44_vm0, %v1469_v34, 0.0 }
 0xc05   :  { %1474 = vadd.xlane.f32.xlu1 %v1473_v35 }
 0xc68   :  { %v1472_v40 = vpop.xlane.xlu2 %1471 }
 0xc69   :  { %v1476_v30 = vmul.f32 %v1472_v40, %v1918_v10 }
 0xc6b   :  { %v1478_v44 = vadd.f32 1e-12, %v1476_v30 }
 0xc6d   :  { %1827 = vrsqrt.f32 %v1478_v44  ;;  %vm1486_vm12 = vweird.f32 %v1478_v44 }
 0xc73   :  { %v1828_v45 = vpop.eup %1827 }
 0xc74   :  { %v1481_v46 = vmul.f32 %v1828_v45, %v1478_v44  ;;  %vm1487_vm8 = vweird.f32 %v1828_v45 }
 0xc75   :  { %vm1488_vm5 = vmor %vm1486_vm12, %vm1487_vm8 }
 0xc76   :  { %v1482_v50 = vmul.f32 %v1828_v45, %v1481_v46 }
 0xc78   :  { %v1483_v52 = vmul.f32 0.5, %v1482_v50  ;;  %v1475_v57 = vpop.xlane.xlu1 %1474 }
 0xc79   :  { %v1477_v54 = vmul.f32 %v1475_v57, %v1918_v10 }
 0xc7a   :  { %v1484_v56 = vsub.f32 1.5, %v1483_v52 }
 0xc7b   :  { %v1479_v58 = vadd.f32 1e-12, %v1477_v54 }
 0xc7c   :  { %v1485_v62 = vmul.f32 %v1828_v45, %v1484_v56 }
 0xc7d   :  { %1829 = vrsqrt.f32 %v1479_v58  ;;  %vm1496_vm10 = vweird.f32 %v1479_v58 }
 0xc7e   :  { %v1489_v10 = vsel %vm1488_vm5, %v1828_v45, %v1485_v62 }
 0xc7f   :  { %v1500_v0 = vmul.f32 %v1489_v10, %v1466_v28 }
 0xc81   :  { %v1503_v1 = vmul.f32 %v1502_v63, %v1500_v0 }
 0xc83   :  { %v1830_v2 = vpop.eup %1829  ;;  %v1506_v59 = vadd.f32 %v1505_v48, %v1503_v1 }
 0xc84   :  { %v1491_v53 = vmul.f32 %v1830_v2, %v1479_v58  ;;  %vm1497_vm9 = vweird.f32 %v1830_v2 }
 0xc85   :  { %1679 = vmatmul.msk.f32.vlgmr.msrb.gmra.mxu1 %vm44_vm0, %v1506_v59  ;;  %vm1498_vm11 = vmor %vm1496_vm10, %vm1497_vm9 }
 0xc86   :  { %v1492_v36 = vmul.f32 %v1830_v2, %v1491_v53 }
 0xc88   :  { %v1493_v3 = vmul.f32 0.5, %v1492_v36 }
 0xc8a   :  { %v1494_v4 = vsub.f32 1.5, %v1493_v3 }
 0xc8c   :  { %v1495_v5 = vmul.f32 %v1830_v2, %v1494_v4 }
 0xc8e   :  { %v1499_v6 = vsel %vm1498_vm11, %v1830_v2, %v1495_v5 }
 0xc8f   :  { %v1501_v7 = vmul.f32 %v1499_v6, %v1467_v33 }
 0xc91   :  { %v1504_v8 = vmul.f32 %v1502_v63, %v1501_v7 }
 0xc93   :  { %v1507_v41 = vadd.f32 %v1505_v48, %v1504_v8 }
 0xc95   :  { %1680 = vmatmul.msk.f32.gmra.mxu1 %vm44_vm0, %v1507_v41 }
 0xd02   :  { %v1537_v14 = vpop.f32.mrf.mxu1 }
 0xd03   :  { %v1538_v15 = vadd.f32 %v1537_v14, %v1513_v13 }
 0xd05   :  { %v1543_v16 = vmax.f32 %v1538_v15, 0.0 }
 0xd07   :  { %1689 = vmatmul.msk.f32.vlgmr.msrb.gmra.mxu3 %vm786_vm1, %v1543_v16 }
 0xd12   :  { %v1540_v17 = vpop.f32.mrf.mxu1 }
 0xd13   :  { %v1541_v18 = vadd.f32 %v1540_v17, %v1513_v13 }
 0xd15   :  { %v1544_v19 = vmax.f32 %v1541_v18, 0.0 }
 0xd17   :  { %1690 = vmatmul.msk.f32.gmra.mxu3 %vm786_vm1, %v1544_v19 }
 0xd8a   :  { %v1578_v21 = vpop.f32.mrf.mxu3 }
 0xd8b   :  { %v1579_v60 = vadd.f32 %v1578_v21, %v1554_v20 }
 0xd8d   :  { %v1584_v23 = vadd.f32 %v1579_v60, %v1506_v59 }
 0xd8f   :  { %1586 = vst.msk [vmem:[#allocation2] sm:$0xff] %vm44_vm0, %v1584_v23 }
 0xd9a   :  { %v1581_v24 = vpop.f32.mrf.mxu3 }
 0xd9b   :  { %v1582_v26 = vadd.f32 %v1581_v24, %v1554_v20 }
 0xd9d   :  { %v1585_v25 = vadd.f32 %v1582_v26, %v1507_v41 }
 0xd9f   :  { %1587 = vst.msk [vmem:[#allocation2 + $0x8] sm:$0xff] %vm44_vm0, %v1585_v25 }
 0xda0   :  { %1600 = dma.vmem_to_hbm [thread:$0]  %s1593_s12, 256, %s1595_s15, [#allocation3], %s1874_s2, %s1874_s2, %s1871_s22  }
 0xda1   :  { %1855 = dma.done.wait [#allocation3], 256  }
 0xda2   :  { %1856 = vsyncadd [#allocation3], 4294967040 }
 0xda3   :  { %1605 = vsyncpa [#allocation3], 1 }

</bundles_post_ra>
